<compile_context>
chip_gen: v7x
topology: tpu7x:2x2x1
jax: 0.10.0
libtpu: 0.0.40
codegen_flags: <defaults>
</compile_context>

<pallas_src>
import jax
import jax.numpy as jnp
from jax import lax
from jax.experimental import pallas as pl
from jax.experimental.pallas import tpu as pltpu


# ----------------------------------------------------------------------------
# Pallas kernel: whole sequence in one grid program per batch tile.
# ----------------------------------------------------------------------------
def _deepar_kernel(x_ref,        # (T, Bt, D)   time-major inputs
                   wih0_ref,     # (D, 4H)
                   whh0_ref,     # (H, 4H)
                   b0_ref,       # (1, 4H)
                   wih1_ref,     # (H, 4H)
                   whh1_ref,     # (H, 4H)
                   b1_ref,       # (1, 4H)
                   wbig_ref,     # (T*H, 2T)   block-diagonal projection weights
                   bbig_ref,     # (1, 2T)     projection bias rows
                   mu_ref,       # (Bt, T)
                   sigma_ref,    # (Bt, T)
                   hs_ref):      # (T, Bt, H)  VMEM scratch: per-step layer-1 h
    T, Bt, D = x_ref.shape
    H = whh0_ref.shape[0]

    # Weights are tiny; load once, reuse across all time steps.
    wih0 = wih0_ref[...]
    whh0 = whh0_ref[...]
    wih1 = wih1_ref[...]
    whh1 = whh1_ref[...]
    # Hoisted bias broadcasts (JAX does not CSE broadcast_in_dim inside loops).
    b0 = jnp.broadcast_to(b0_ref[...], (Bt, 4 * H))
    b1 = jnp.broadcast_to(b1_ref[...], (Bt, 4 * H))

    def lstm_update(gates, c_prev):
        # Gate column order (host-permuted): i, f, o, g ; g columns pre-scaled
        # by 2 so a single full-width sigmoid covers all four gates and
        # tanh(g_raw) = 2*sigmoid(2*g_raw) - 1 is a VPU fma.
        act = jax.nn.sigmoid(gates)                      # one EUP push, 4H wide
        i = act[:, 0:H]
        f = act[:, H:2 * H]
        o = act[:, 2 * H:3 * H]
        g = 2.0 * act[:, 3 * H:4 * H] - 1.0
        c_new = f * c_prev + i * g
        h_new = o * jnp.tanh(c_new)
        return h_new, c_new

    def step(t, carry):
        h0, c0, h1, c1 = carry
        x_t = x_ref[t]                                   # (Bt, D) leading-axis load
        if D == 1:
            # Input contribution as a VPU broadcast multiply (no concat, no MXU).
            in0 = x_t * wih0                             # (Bt,1)*(1,4H) -> (Bt,4H)
        else:
            in0 = jnp.dot(x_t, wih0, preferred_element_type=jnp.float32)
        g0 = in0 + jnp.dot(h0, whh0, preferred_element_type=jnp.float32) + b0
        h0, c0 = lstm_update(g0, c0)
        g1 = (jnp.dot(h0, wih1, preferred_element_type=jnp.float32)
              + jnp.dot(h1, whh1, preferred_element_type=jnp.float32) + b1)
        h1, c1 = lstm_update(g1, c1)
        hs_ref[t] = h1                                   # off the recurrence chain
        return (h0, c0, h1, c1)

    z = jnp.zeros((Bt, H), jnp.float32)
    unroll = T if T <= 8 else 8                          # explicit partial unroll
    lax.fori_loop(0, T, step, (z, z, z, z), unroll=unroll)

    # --- Epilogue (once, after the loop) -------------------------------------
    # Assemble all hidden states lane-wise and project with a block-diagonal
    # weight: one MXU matmul, one softplus slab, two lane-dense stores.
    big = jnp.concatenate([hs_ref[u] for u in range(T)], axis=1)   # (Bt, T*H)
    p = (jnp.dot(big, wbig_ref[...], preferred_element_type=jnp.float32)
         + bbig_ref[...])                                          # (Bt, 2T)
    mu_ref[...] = p[:, 0:T]
    sigma_ref[...] = jax.nn.softplus(p[:, T:2 * T]) + 0.001


# ----------------------------------------------------------------------------
# Host-side parameter plumbing.
# ----------------------------------------------------------------------------
def _permute_scale_gates(w, H):
    # PyTorch gate-column order (i, f, g, o) -> kernel order (i, f, o, g),
    # with the g block scaled by 2 (tanh via sigmoid trick).
    return jnp.concatenate(
        [w[:, 0:2 * H], w[:, 3 * H:4 * H], 2.0 * w[:, 2 * H:3 * H]], axis=1)


def prepare_kernel_params(params, T):
    H = params["whh0"].shape[0]
    wih0 = _permute_scale_gates(params["wih0"], H)
    whh0 = _permute_scale_gates(params["whh0"], H)
    b0 = _permute_scale_gates(params["b0"], H)
    wih1 = _permute_scale_gates(params["wih1"], H)
    whh1 = _permute_scale_gates(params["whh1"], H)
    b1 = _permute_scale_gates(params["b1"], H)
    wp = params["wp"].astype(jnp.float32)                # (H, 2)
    bp = params["bp"].astype(jnp.float32)                # (1, 2)
    # Block-diagonal projection: out[b, t]      = <h1[t, b, :], wp[:, 0]> + bp[0]
    #                            out[b, T + t]  = <h1[t, b, :], wp[:, 1]> + bp[1]
    eye_t = jnp.eye(T, dtype=jnp.float32)
    wbig = jnp.concatenate([jnp.kron(eye_t, wp[:, 0:1]),
                            jnp.kron(eye_t, wp[:, 1:2])], axis=1)  # (T*H, 2T)
    bbig = jnp.concatenate([jnp.broadcast_to(bp[0:1, 0:1], (1, T)),
                            jnp.broadcast_to(bp[0:1, 1:2], (1, T))], axis=1)
    return wih0, whh0, b0, wih1, whh1, b1, wbig, bbig


def deepar_forward(x, params):
    """x: (B, T, D) float32.  Returns (mu, sigma), each (B, T)."""
    B, T, D = x.shape
    H = params["whh0"].shape[0]
    x = x.astype(jnp.float32)

    # Pad the batch to a sublane-friendly multiple and tile it over a parallel
    # grid axis (near-2x on multi-TensorCore parts once B is non-trivial).
    if B >= 128:
        b_tile = 128
    else:
        b_tile = max(8, ((B + 7) // 8) * 8)
    b_pad = ((B + b_tile - 1) // b_tile) * b_tile
    if b_pad != B:
        x = jnp.pad(x, ((0, b_pad - B), (0, 0), (0, 0)))
    x_tbd = jnp.transpose(x, (1, 0, 2))                  # (T, b_pad, D) time-major

    wih0, whh0, b0, wih1, whh1, b1, wbig, bbig = prepare_kernel_params(params, T)

    n_bt = b_pad // b_tile

    def full_spec(a):
        return pl.BlockSpec(a.shape, lambda i: (0,) * a.ndim)

    mu, sigma = pl.pallas_call(
        _deepar_kernel,
        out_shape=(jax.ShapeDtypeStruct((b_pad, T), jnp.float32),
                   jax.ShapeDtypeStruct((b_pad, T), jnp.float32)),
        grid=(n_bt,),
        in_specs=[
            pl.BlockSpec((T, b_tile, D), lambda i: (0, i, 0)),
            full_spec(wih0), full_spec(whh0), full_spec(b0),
            full_spec(wih1), full_spec(whh1), full_spec(b1),
            full_spec(wbig), full_spec(bbig),
        ],
        out_specs=(pl.BlockSpec((b_tile, T), lambda i: (i, 0)),
                   pl.BlockSpec((b_tile, T), lambda i: (i, 0))),
        scratch_shapes=[pltpu.VMEM((T, b_tile, H), jnp.float32)],
        compiler_params=pltpu.CompilerParams(dimension_semantics=("parallel",)),
    )(x_tbd, wih0, whh0, b0, wih1, whh1, b1, wbig, bbig)

    return mu[:B], sigma[:B]


# ----------------------------------------------------------------------------
# Deterministic parameter init (PyTorch-style U(-1/sqrt(H), 1/sqrt(H)),
# canonical PyTorch gate order i, f, g, o; weights pre-transposed to (in, 4H)).
# ----------------------------------------------------------------------------
def init_deepar_params(key, input_dim=1, rnn_hidden=32):
    H = rnn_hidden
    stdv = 1.0 / jnp.sqrt(jnp.float32(H))
    ks = jax.random.split(key, 12)

    def u(k, shape):
        return jax.random.uniform(k, shape, jnp.float32, -stdv, stdv)

    return {
        "wih0": u(ks[0], (input_dim, 4 * H)),
        "whh0": u(ks[1], (H, 4 * H)),
        "b0":   (u(ks[2], (1, 4 * H)) + u(ks[3], (1, 4 * H))),   # b_ih + b_hh
        "wih1": u(ks[4], (H, 4 * H)),
        "whh1": u(ks[5], (H, 4 * H)),
        "b1":   (u(ks[6], (1, 4 * H)) + u(ks[7], (1, 4 * H))),
        "wp":   u(ks[8], (H, 2)),
        "bp":   u(ks[9], (1, 2)),
    }


# ----------------------------------------------------------------------------
# Pure-JAX reference (PyTorch gate order, HIGHEST precision) for correctness.
# ----------------------------------------------------------------------------
def deepar_forward_ref(x, params):
    B, T, D = x.shape
    H = params["whh0"].shape[0]

    def cell(x_t, h, c, wih, whh, b):
        gates = (jnp.dot(x_t, wih, precision=lax.Precision.HIGHEST)
                 + jnp.dot(h, whh, precision=lax.Precision.HIGHEST) + b)
        i = jax.nn.sigmoid(gates[:, 0 * H:1 * H])
        f = jax.nn.sigmoid(gates[:, 1 * H:2 * H])
        g = jnp.tanh(gates[:, 2 * H:3 * H])
        o = jax.nn.sigmoid(gates[:, 3 * H:4 * H])
        c_new = f * c + i * g
        h_new = o * jnp.tanh(c_new)
        return h_new, c_new

    def step(carry, x_t):
        h0, c0, h1, c1 = carry
        h0, c0 = cell(x_t, h0, c0, params["wih0"], params["whh0"], params["b0"])
        h1, c1 = cell(h0, h1, c1, params["wih1"], params["whh1"], params["b1"])
        p = jnp.dot(h1, params["wp"], precision=lax.Precision.HIGHEST) + params["bp"]
        return (h0, c0, h1, c1), p

    z = jnp.zeros((B, H), jnp.float32)
    _, ps = lax.scan(step, (z, z, z, z), jnp.transpose(x, (1, 0, 2)))  # (T, B, 2)
    mu = jnp.transpose(ps[:, :, 0])
    sigma = jnp.transpose(jax.nn.softplus(ps[:, :, 1]) + 0.001)
    return mu, sigma


# TODO(synk): compute_loss (Gaussian NLL) and predict (ancestral multi-step
# rollout) from the PyTorch module are not part of forward(); not kernelized.

if __name__ == "__main__":
    B, T, D, H = 8, 8, 1, 32

    key = jax.random.PRNGKey(0)
    k_par, k_x = jax.random.split(key)
    params = init_deepar_params(k_par, input_dim=D, rnn_hidden=H)
    x = jax.random.normal(k_x, (B, T, D), jnp.float32)

    mu, sigma = jax.jit(deepar_forward)(x, params)
    jax.block_until_ready((mu, sigma))

    mu_ref, sigma_ref = deepar_forward_ref(x, params)
    assert mu.shape == (B, T) and sigma.shape == (B, T)
    # Kernel uses DEFAULT MXU precision (bf16 passes); reference uses HIGHEST.
    assert jnp.allclose(mu, mu_ref, atol=2e-2, rtol=2e-2)
    assert jnp.allclose(sigma, sigma_ref, atol=2e-2, rtol=2e-2)
    assert bool(jnp.all(sigma > 0.0))

    print("KERNEL_OK")
</pallas_src>

<mosaic_0001>
module attributes {stable_mosaic.version = 11 : i64} {
  func.func @_deepar_kernel(%arg0: i32, %arg1: memref<8x8x1xf32, #tpu.memory_space<vmem>>, %arg2: memref<1x128xf32, #tpu.memory_space<vmem>>, %arg3: memref<32x128xf32, #tpu.memory_space<vmem>>, %arg4: memref<1x128xf32, #tpu.memory_space<vmem>>, %arg5: memref<32x128xf32, #tpu.memory_space<vmem>>, %arg6: memref<32x128xf32, #tpu.memory_space<vmem>>, %arg7: memref<1x128xf32, #tpu.memory_space<vmem>>, %arg8: memref<256x16xf32, #tpu.memory_space<vmem>>, %arg9: memref<1x16xf32, #tpu.memory_space<vmem>>, %arg10: memref<8x8xf32, #tpu.memory_space<vmem>>, %arg11: memref<8x8xf32, #tpu.memory_space<vmem>>, %arg12: memref<8x8x32xf32, #tpu.memory_space<vmem>>) attributes {dimension_semantics = [#tpu.dimension_semantics<parallel>], iteration_bounds = array<i64: 1>, scalar_prefetch = 0 : i64, scratch_operands = 1 : i64, tpu.core_type = #tpu.core_type<tc>, window_params = [{transform_indices = @transform_0, window_bounds = array<i64: 8, 8, 1>}, {pipeline_mode = #tpu.pipeline_mode<synchronous>, transform_indices = @transform_1, window_bounds = array<i64: 1, 128>}, {pipeline_mode = #tpu.pipeline_mode<synchronous>, transform_indices = @transform_2, window_bounds = array<i64: 32, 128>}, {pipeline_mode = #tpu.pipeline_mode<synchronous>, transform_indices = @transform_3, window_bounds = array<i64: 1, 128>}, {pipeline_mode = #tpu.pipeline_mode<synchronous>, transform_indices = @transform_4, window_bounds = array<i64: 32, 128>}, {pipeline_mode = #tpu.pipeline_mode<synchronous>, transform_indices = @transform_5, window_bounds = array<i64: 32, 128>}, {pipeline_mode = #tpu.pipeline_mode<synchronous>, transform_indices = @transform_6, window_bounds = array<i64: 1, 128>}, {pipeline_mode = #tpu.pipeline_mode<synchronous>, transform_indices = @transform_7, window_bounds = array<i64: 256, 16>}, {pipeline_mode = #tpu.pipeline_mode<synchronous>, transform_indices = @transform_8, window_bounds = array<i64: 1, 16>}, {transform_indices = @transform_9, window_bounds = array<i64: 8, 8>}, {transform_indices = @transform_10, window_bounds = array<i64: 8, 8>}]} {
    %c0 = arith.constant 0 : index
    %c0_0 = arith.constant 0 : index
    %0 = vector.load %arg2[%c0, %c0_0] : memref<1x128xf32, #tpu.memory_space<vmem>>, vector<1x128xf32>
    %c0_1 = arith.constant 0 : index
    %c0_2 = arith.constant 0 : index
    %1 = vector.load %arg3[%c0_1, %c0_2] : memref<32x128xf32, #tpu.memory_space<vmem>>, vector<32x128xf32>
    %c0_3 = arith.constant 0 : index
    %c0_4 = arith.constant 0 : index
    %2 = vector.load %arg5[%c0_3, %c0_4] : memref<32x128xf32, #tpu.memory_space<vmem>>, vector<32x128xf32>
    %c0_5 = arith.constant 0 : index
    %c0_6 = arith.constant 0 : index
    %3 = vector.load %arg6[%c0_5, %c0_6] : memref<32x128xf32, #tpu.memory_space<vmem>>, vector<32x128xf32>
    %c0_7 = arith.constant 0 : index
    %c0_8 = arith.constant 0 : index
    %4 = vector.load %arg4[%c0_7, %c0_8] : memref<1x128xf32, #tpu.memory_space<vmem>>, vector<1x128xf32>
    %5 = vector.shape_cast %4 : vector<1x128xf32> to vector<1x128xf32>
    %6 = vector.broadcast %5 : vector<1x128xf32> to vector<8x128xf32>
    %c0_9 = arith.constant 0 : index
    %c0_10 = arith.constant 0 : index
    %7 = vector.load %arg7[%c0_9, %c0_10] : memref<1x128xf32, #tpu.memory_space<vmem>>, vector<1x128xf32>
    %8 = vector.shape_cast %7 : vector<1x128xf32> to vector<1x128xf32>
    %9 = vector.broadcast %8 : vector<1x128xf32> to vector<8x128xf32>
    %cst = arith.constant 0.000000e+00 : f32
    %10 = vector.broadcast %cst : f32 to vector<8x32xf32>
    %c0_i32 = arith.constant 0 : i32
    %11 = arith.index_cast %c0_i32 : i32 to index
    %c0_11 = arith.constant 0 : index
    %c0_12 = arith.constant 0 : index
    %12 = vector.load %arg1[%11, %c0_11, %c0_12] : memref<8x8x1xf32, #tpu.memory_space<vmem>>, vector<1x8x1xf32>
    %13 = vector.shape_cast %12 : vector<1x8x1xf32> to vector<8x1xf32>
    %14 = vector.broadcast %13 : vector<8x1xf32> to vector<8x128xf32>
    %15 = vector.broadcast %0 : vector<1x128xf32> to vector<8x128xf32>
    %16 = arith.mulf %14, %15 : vector<8x128xf32>
    %cst_13 = arith.constant dense<0.000000e+00> : vector<8x128xf32>
    %17 = tpu.matmul %10, %1, %cst_13 {dimension_numbers = #tpu.dot_dimension_numbers<[1], [0], [0], [1], [0, 0, 1, 1], [], []>} : vector<8x32xf32>, vector<32x128xf32>, vector<8x128xf32> -> vector<8x128xf32>
    %18 = arith.addf %16, %17 : vector<8x128xf32>
    %19 = arith.addf %18, %6 : vector<8x128xf32>
    %20 = arith.negf %19 : vector<8x128xf32>
    %21 = math.exp %20 : vector<8x128xf32>
    %cst_14 = arith.constant 1.000000e+00 : f32
    %22 = vector.broadcast %cst_14 : f32 to vector<8x128xf32>
    %23 = arith.addf %22, %21 : vector<8x128xf32>
    %24 = arith.divf %22, %23 : vector<8x128xf32>
    %25 = vector.extract_strided_slice %24 {offsets = [0, 0], sizes = [8, 32], strides = [1, 1]} : vector<8x128xf32> to vector<8x32xf32>
    %26 = vector.extract_strided_slice %24 {offsets = [0, 32], sizes = [8, 32], strides = [1, 1]} : vector<8x128xf32> to vector<8x32xf32>
    %27 = vector.extract_strided_slice %24 {offsets = [0, 64], sizes = [8, 32], strides = [1, 1]} : vector<8x128xf32> to vector<8x32xf32>
    %28 = vector.extract_strided_slice %24 {offsets = [0, 96], sizes = [8, 32], strides = [1, 1]} : vector<8x128xf32> to vector<8x32xf32>
    %cst_15 = arith.constant 2.000000e+00 : f32
    %29 = vector.broadcast %cst_15 : f32 to vector<8x32xf32>
    %30 = arith.mulf %29, %28 : vector<8x32xf32>
    %cst_16 = arith.constant 1.000000e+00 : f32
    %31 = vector.broadcast %cst_16 : f32 to vector<8x32xf32>
    %32 = arith.subf %30, %31 : vector<8x32xf32>
    %33 = arith.mulf %26, %10 : vector<8x32xf32>
    %34 = arith.mulf %25, %32 : vector<8x32xf32>
    %35 = arith.addf %33, %34 : vector<8x32xf32>
    %36 = math.tanh %35 : vector<8x32xf32>
    %37 = arith.mulf %27, %36 : vector<8x32xf32>
    %cst_17 = arith.constant dense<0.000000e+00> : vector<8x128xf32>
    %38 = tpu.matmul %37, %2, %cst_17 {dimension_numbers = #tpu.dot_dimension_numbers<[1], [0], [0], [1], [0, 0, 1, 1], [], []>} : vector<8x32xf32>, vector<32x128xf32>, vector<8x128xf32> -> vector<8x128xf32>
    %cst_18 = arith.constant dense<0.000000e+00> : vector<8x128xf32>
    %39 = tpu.matmul %10, %3, %cst_18 {dimension_numbers = #tpu.dot_dimension_numbers<[1], [0], [0], [1], [0, 0, 1, 1], [], []>} : vector<8x32xf32>, vector<32x128xf32>, vector<8x128xf32> -> vector<8x128xf32>
    %40 = arith.addf %38, %39 : vector<8x128xf32>
    %41 = arith.addf %40, %9 : vector<8x128xf32>
    %42 = arith.negf %41 : vector<8x128xf32>
    %43 = math.exp %42 : vector<8x128xf32>
    %cst_19 = arith.constant 1.000000e+00 : f32
    %44 = vector.broadcast %cst_19 : f32 to vector<8x128xf32>
    %45 = arith.addf %44, %43 : vector<8x128xf32>
    %46 = arith.divf %44, %45 : vector<8x128xf32>
    %47 = vector.extract_strided_slice %46 {offsets = [0, 0], sizes = [8, 32], strides = [1, 1]} : vector<8x128xf32> to vector<8x32xf32>
    %48 = vector.extract_strided_slice %46 {offsets = [0, 32], sizes = [8, 32], strides = [1, 1]} : vector<8x128xf32> to vector<8x32xf32>
    %49 = vector.extract_strided_slice %46 {offsets = [0, 64], sizes = [8, 32], strides = [1, 1]} : vector<8x128xf32> to vector<8x32xf32>
    %50 = vector.extract_strided_slice %46 {offsets = [0, 96], sizes = [8, 32], strides = [1, 1]} : vector<8x128xf32> to vector<8x32xf32>
    %cst_20 = arith.constant 2.000000e+00 : f32
    %51 = vector.broadcast %cst_20 : f32 to vector<8x32xf32>
    %52 = arith.mulf %51, %50 : vector<8x32xf32>
    %cst_21 = arith.constant 1.000000e+00 : f32
    %53 = vector.broadcast %cst_21 : f32 to vector<8x32xf32>
    %54 = arith.subf %52, %53 : vector<8x32xf32>
    %55 = arith.mulf %48, %10 : vector<8x32xf32>
    %56 = arith.mulf %47, %54 : vector<8x32xf32>
    %57 = arith.addf %55, %56 : vector<8x32xf32>
    %58 = math.tanh %57 : vector<8x32xf32>
    %59 = arith.mulf %49, %58 : vector<8x32xf32>
    %60 = arith.index_cast %c0_i32 : i32 to index
    %c0_22 = arith.constant 0 : index
    %c0_23 = arith.constant 0 : index
    %61 = vector.load %arg12[%60, %c0_22, %c0_23] : memref<8x8x32xf32, #tpu.memory_space<vmem>>, vector<1x8x32xf32>
    %62 = vector.shape_cast %61 : vector<1x8x32xf32> to vector<8x32xf32>
    %63 = vector.shape_cast %59 : vector<8x32xf32> to vector<1x8x32xf32>
    tpu.vector_store %arg12[%60, %c0_22, %c0_23], %63 {strides = array<i32>} : memref<8x8x32xf32, #tpu.memory_space<vmem>>, vector<1x8x32xf32>,
    %c1_i32 = arith.constant 1 : i32
    %64 = arith.index_cast %c1_i32 : i32 to index
    %c0_24 = arith.constant 0 : index
    %c0_25 = arith.constant 0 : index
    %65 = vector.load %arg1[%64, %c0_24, %c0_25] : memref<8x8x1xf32, #tpu.memory_space<vmem>>, vector<1x8x1xf32>
    %66 = vector.shape_cast %65 : vector<1x8x1xf32> to vector<8x1xf32>
    %67 = vector.broadcast %66 : vector<8x1xf32> to vector<8x128xf32>
    %68 = vector.broadcast %0 : vector<1x128xf32> to vector<8x128xf32>
    %69 = arith.mulf %67, %68 : vector<8x128xf32>
    %cst_26 = arith.constant dense<0.000000e+00> : vector<8x128xf32>
    %70 = tpu.matmul %37, %1, %cst_26 {dimension_numbers = #tpu.dot_dimension_numbers<[1], [0], [0], [1], [0, 0, 1, 1], [], []>} : vector<8x32xf32>, vector<32x128xf32>, vector<8x128xf32> -> vector<8x128xf32>
    %71 = arith.addf %69, %70 : vector<8x128xf32>
    %72 = arith.addf %71, %6 : vector<8x128xf32>
    %73 = arith.negf %72 : vector<8x128xf32>
    %74 = math.exp %73 : vector<8x128xf32>
    %cst_27 = arith.constant 1.000000e+00 : f32
    %75 = vector.broadcast %cst_27 : f32 to vector<8x128xf32>
    %76 = arith.addf %75, %74 : vector<8x128xf32>
    %77 = arith.divf %75, %76 : vector<8x128xf32>
    %78 = vector.extract_strided_slice %77 {offsets = [0, 0], sizes = [8, 32], strides = [1, 1]} : vector<8x128xf32> to vector<8x32xf32>
    %79 = vector.extract_strided_slice %77 {offsets = [0, 32], sizes = [8, 32], strides = [1, 1]} : vector<8x128xf32> to vector<8x32xf32>
    %80 = vector.extract_strided_slice %77 {offsets = [0, 64], sizes = [8, 32], strides = [1, 1]} : vector<8x128xf32> to vector<8x32xf32>
    %81 = vector.extract_strided_slice %77 {offsets = [0, 96], sizes = [8, 32], strides = [1, 1]} : vector<8x128xf32> to vector<8x32xf32>
    %cst_28 = arith.constant 2.000000e+00 : f32
    %82 = vector.broadcast %cst_28 : f32 to vector<8x32xf32>
    %83 = arith.mulf %82, %81 : vector<8x32xf32>
    %cst_29 = arith.constant 1.000000e+00 : f32
    %84 = vector.broadcast %cst_29 : f32 to vector<8x32xf32>
    %85 = arith.subf %83, %84 : vector<8x32xf32>
    %86 = arith.mulf %79, %35 : vector<8x32xf32>
    %87 = arith.mulf %78, %85 : vector<8x32xf32>
    %88 = arith.addf %86, %87 : vector<8x32xf32>
    %89 = math.tanh %88 : vector<8x32xf32>
    %90 = arith.mulf %80, %89 : vector<8x32xf32>
    %cst_30 = arith.constant dense<0.000000e+00> : vector<8x128xf32>
    %91 = tpu.matmul %90, %2, %cst_30 {dimension_numbers = #tpu.dot_dimension_numbers<[1], [0], [0], [1], [0, 0, 1, 1], [], []>} : vector<8x32xf32>, vector<32x128xf32>, vector<8x128xf32> -> vector<8x128xf32>
    %cst_31 = arith.constant dense<0.000000e+00> : vector<8x128xf32>
    %92 = tpu.matmul %59, %3, %cst_31 {dimension_numbers = #tpu.dot_dimension_numbers<[1], [0], [0], [1], [0, 0, 1, 1], [], []>} : vector<8x32xf32>, vector<32x128xf32>, vector<8x128xf32> -> vector<8x128xf32>
    %93 = arith.addf %91, %92 : vector<8x128xf32>
    %94 = arith.addf %93, %9 : vector<8x128xf32>
    %95 = arith.negf %94 : vector<8x128xf32>
    %96 = math.exp %95 : vector<8x128xf32>
    %cst_32 = arith.constant 1.000000e+00 : f32
    %97 = vector.broadcast %cst_32 : f32 to vector<8x128xf32>
    %98 = arith.addf %97, %96 : vector<8x128xf32>
    %99 = arith.divf %97, %98 : vector<8x128xf32>
    %100 = vector.extract_strided_slice %99 {offsets = [0, 0], sizes = [8, 32], strides = [1, 1]} : vector<8x128xf32> to vector<8x32xf32>
    %101 = vector.extract_strided_slice %99 {offsets = [0, 32], sizes = [8, 32], strides = [1, 1]} : vector<8x128xf32> to vector<8x32xf32>
    %102 = vector.extract_strided_slice %99 {offsets = [0, 64], sizes = [8, 32], strides = [1, 1]} : vector<8x128xf32> to vector<8x32xf32>
    %103 = vector.extract_strided_slice %99 {offsets = [0, 96], sizes = [8, 32], strides = [1, 1]} : vector<8x128xf32> to vector<8x32xf32>
    %cst_33 = arith.constant 2.000000e+00 : f32
    %104 = vector.broadcast %cst_33 : f32 to vector<8x32xf32>
    %105 = arith.mulf %104, %103 : vector<8x32xf32>
    %cst_34 = arith.constant 1.000000e+00 : f32
    %106 = vector.broadcast %cst_34 : f32 to vector<8x32xf32>
    %107 = arith.subf %105, %106 : vector<8x32xf32>
    %108 = arith.mulf %101, %57 : vector<8x32xf32>
    %109 = arith.mulf %100, %107 : vector<8x32xf32>
    %110 = arith.addf %108, %109 : vector<8x32xf32>
    %111 = math.tanh %110 : vector<8x32xf32>
    %112 = arith.mulf %102, %111 : vector<8x32xf32>
    %113 = arith.index_cast %c1_i32 : i32 to index
    %c0_35 = arith.constant 0 : index
    %c0_36 = arith.constant 0 : index
    %114 = vector.load %arg12[%113, %c0_35, %c0_36] : memref<8x8x32xf32, #tpu.memory_space<vmem>>, vector<1x8x32xf32>
    %115 = vector.shape_cast %114 : vector<1x8x32xf32> to vector<8x32xf32>
    %116 = vector.shape_cast %112 : vector<8x32xf32> to vector<1x8x32xf32>
    tpu.vector_store %arg12[%113, %c0_35, %c0_36], %116 {strides = array<i32>} : memref<8x8x32xf32, #tpu.memory_space<vmem>>, vector<1x8x32xf32>,
    %c2_i32 = arith.constant 2 : i32
    %117 = arith.index_cast %c2_i32 : i32 to index
    %c0_37 = arith.constant 0 : index
    %c0_38 = arith.constant 0 : index
    %118 = vector.load %arg1[%117, %c0_37, %c0_38] : memref<8x8x1xf32, #tpu.memory_space<vmem>>, vector<1x8x1xf32>
    %119 = vector.shape_cast %118 : vector<1x8x1xf32> to vector<8x1xf32>
    %120 = vector.broadcast %119 : vector<8x1xf32> to vector<8x128xf32>
    %121 = vector.broadcast %0 : vector<1x128xf32> to vector<8x128xf32>
    %122 = arith.mulf %120, %121 : vector<8x128xf32>
    %cst_39 = arith.constant dense<0.000000e+00> : vector<8x128xf32>
    %123 = tpu.matmul %90, %1, %cst_39 {dimension_numbers = #tpu.dot_dimension_numbers<[1], [0], [0], [1], [0, 0, 1, 1], [], []>} : vector<8x32xf32>, vector<32x128xf32>, vector<8x128xf32> -> vector<8x128xf32>
    %124 = arith.addf %122, %123 : vector<8x128xf32>
    %125 = arith.addf %124, %6 : vector<8x128xf32>
    %126 = arith.negf %125 : vector<8x128xf32>
    %127 = math.exp %126 : vector<8x128xf32>
    %cst_40 = arith.constant 1.000000e+00 : f32
    %128 = vector.broadcast %cst_40 : f32 to vector<8x128xf32>
    %129 = arith.addf %128, %127 : vector<8x128xf32>
    %130 = arith.divf %128, %129 : vector<8x128xf32>
    %131 = vector.extract_strided_slice %130 {offsets = [0, 0], sizes = [8, 32], strides = [1, 1]} : vector<8x128xf32> to vector<8x32xf32>
    %132 = vector.extract_strided_slice %130 {offsets = [0, 32], sizes = [8, 32], strides = [1, 1]} : vector<8x128xf32> to vector<8x32xf32>
    %133 = vector.extract_strided_slice %130 {offsets = [0, 64], sizes = [8, 32], strides = [1, 1]} : vector<8x128xf32> to vector<8x32xf32>
    %134 = vector.extract_strided_slice %130 {offsets = [0, 96], sizes = [8, 32], strides = [1, 1]} : vector<8x128xf32> to vector<8x32xf32>
    %cst_41 = arith.constant 2.000000e+00 : f32
    %135 = vector.broadcast %cst_41 : f32 to vector<8x32xf32>
    %136 = arith.mulf %135, %134 : vector<8x32xf32>
    %cst_42 = arith.constant 1.000000e+00 : f32
    %137 = vector.broadcast %cst_42 : f32 to vector<8x32xf32>
    %138 = arith.subf %136, %137 : vector<8x32xf32>
    %139 = arith.mulf %132, %88 : vector<8x32xf32>
    %140 = arith.mulf %131, %138 : vector<8x32xf32>
    %141 = arith.addf %139, %140 : vector<8x32xf32>
    %142 = math.tanh %141 : vector<8x32xf32>
    %143 = arith.mulf %133, %142 : vector<8x32xf32>
    %cst_43 = arith.constant dense<0.000000e+00> : vector<8x128xf32>
    %144 = tpu.matmul %143, %2, %cst_43 {dimension_numbers = #tpu.dot_dimension_numbers<[1], [0], [0], [1], [0, 0, 1, 1], [], []>} : vector<8x32xf32>, vector<32x128xf32>, vector<8x128xf32> -> vector<8x128xf32>
    %cst_44 = arith.constant dense<0.000000e+00> : vector<8x128xf32>
    %145 = tpu.matmul %112, %3, %cst_44 {dimension_numbers = #tpu.dot_dimension_numbers<[1], [0], [0], [1], [0, 0, 1, 1], [], []>} : vector<8x32xf32>, vector<32x128xf32>, vector<8x128xf32> -> vector<8x128xf32>
    %146 = arith.addf %144, %145 : vector<8x128xf32>
    %147 = arith.addf %146, %9 : vector<8x128xf32>
    %148 = arith.negf %147 : vector<8x128xf32>
    %149 = math.exp %148 : vector<8x128xf32>
    %cst_45 = arith.constant 1.000000e+00 : f32
    %150 = vector.broadcast %cst_45 : f32 to vector<8x128xf32>
    %151 = arith.addf %150, %149 : vector<8x128xf32>
    %152 = arith.divf %150, %151 : vector<8x128xf32>
    %153 = vector.extract_strided_slice %152 {offsets = [0, 0], sizes = [8, 32], strides = [1, 1]} : vector<8x128xf32> to vector<8x32xf32>
    %154 = vector.extract_strided_slice %152 {offsets = [0, 32], sizes = [8, 32], strides = [1, 1]} : vector<8x128xf32> to vector<8x32xf32>
    %155 = vector.extract_strided_slice %152 {offsets = [0, 64], sizes = [8, 32], strides = [1, 1]} : vector<8x128xf32> to vector<8x32xf32>
    %156 = vector.extract_strided_slice %152 {offsets = [0, 96], sizes = [8, 32], strides = [1, 1]} : vector<8x128xf32> to vector<8x32xf32>
    %cst_46 = arith.constant 2.000000e+00 : f32
    %157 = vector.broadcast %cst_46 : f32 to vector<8x32xf32>
    %158 = arith.mulf %157, %156 : vector<8x32xf32>
    %cst_47 = arith.constant 1.000000e+00 : f32
    %159 = vector.broadcast %cst_47 : f32 to vector<8x32xf32>
    %160 = arith.subf %158, %159 : vector<8x32xf32>
    %161 = arith.mulf %154, %110 : vector<8x32xf32>
    %162 = arith.mulf %153, %160 : vector<8x32xf32>
    %163 = arith.addf %161, %162 : vector<8x32xf32>
    %164 = math.tanh %163 : vector<8x32xf32>
    %165 = arith.mulf %155, %164 : vector<8x32xf32>
    %166 = arith.index_cast %c2_i32 : i32 to index
    %c0_48 = arith.constant 0 : index
    %c0_49 = arith.constant 0 : index
    %167 = vector.load %arg12[%166, %c0_48, %c0_49] : memref<8x8x32xf32, #tpu.memory_space<vmem>>, vector<1x8x32xf32>
    %168 = vector.shape_cast %167 : vector<1x8x32xf32> to vector<8x32xf32>
    %169 = vector.shape_cast %165 : vector<8x32xf32> to vector<1x8x32xf32>
    tpu.vector_store %arg12[%166, %c0_48, %c0_49], %169 {strides = array<i32>} : memref<8x8x32xf32, #tpu.memory_space<vmem>>, vector<1x8x32xf32>,
    %c3_i32 = arith.constant 3 : i32
    %170 = arith.index_cast %c3_i32 : i32 to index
    %c0_50 = arith.constant 0 : index
    %c0_51 = arith.constant 0 : index
    %171 = vector.load %arg1[%170, %c0_50, %c0_51] : memref<8x8x1xf32, #tpu.memory_space<vmem>>, vector<1x8x1xf32>
    %172 = vector.shape_cast %171 : vector<1x8x1xf32> to vector<8x1xf32>
    %173 = vector.broadcast %172 : vector<8x1xf32> to vector<8x128xf32>
    %174 = vector.broadcast %0 : vector<1x128xf32> to vector<8x128xf32>
    %175 = arith.mulf %173, %174 : vector<8x128xf32>
    %cst_52 = arith.constant dense<0.000000e+00> : vector<8x128xf32>
    %176 = tpu.matmul %143, %1, %cst_52 {dimension_numbers = #tpu.dot_dimension_numbers<[1], [0], [0], [1], [0, 0, 1, 1], [], []>} : vector<8x32xf32>, vector<32x128xf32>, vector<8x128xf32> -> vector<8x128xf32>
    %177 = arith.addf %175, %176 : vector<8x128xf32>
    %178 = arith.addf %177, %6 : vector<8x128xf32>
    %179 = arith.negf %178 : vector<8x128xf32>
    %180 = math.exp %179 : vector<8x128xf32>
    %cst_53 = arith.constant 1.000000e+00 : f32
    %181 = vector.broadcast %cst_53 : f32 to vector<8x128xf32>
    %182 = arith.addf %181, %180 : vector<8x128xf32>
    %183 = arith.divf %181, %182 : vector<8x128xf32>
    %184 = vector.extract_strided_slice %183 {offsets = [0, 0], sizes = [8, 32], strides = [1, 1]} : vector<8x128xf32> to vector<8x32xf32>
    %185 = vector.extract_strided_slice %183 {offsets = [0, 32], sizes = [8, 32], strides = [1, 1]} : vector<8x128xf32> to vector<8x32xf32>
    %186 = vector.extract_strided_slice %183 {offsets = [0, 64], sizes = [8, 32], strides = [1, 1]} : vector<8x128xf32> to vector<8x32xf32>
    %187 = vector.extract_strided_slice %183 {offsets = [0, 96], sizes = [8, 32], strides = [1, 1]} : vector<8x128xf32> to vector<8x32xf32>
    %cst_54 = arith.constant 2.000000e+00 : f32
    %188 = vector.broadcast %cst_54 : f32 to vector<8x32xf32>
    %189 = arith.mulf %188, %187 : vector<8x32xf32>
    %cst_55 = arith.constant 1.000000e+00 : f32
    %190 = vector.broadcast %cst_55 : f32 to vector<8x32xf32>
    %191 = arith.subf %189, %190 : vector<8x32xf32>
    %192 = arith.mulf %185, %141 : vector<8x32xf32>
    %193 = arith.mulf %184, %191 : vector<8x32xf32>
    %194 = arith.addf %192, %193 : vector<8x32xf32>
    %195 = math.tanh %194 : vector<8x32xf32>
    %196 = arith.mulf %186, %195 : vector<8x32xf32>
    %cst_56 = arith.constant dense<0.000000e+00> : vector<8x128xf32>
    %197 = tpu.matmul %196, %2, %cst_56 {dimension_numbers = #tpu.dot_dimension_numbers<[1], [0], [0], [1], [0, 0, 1, 1], [], []>} : vector<8x32xf32>, vector<32x128xf32>, vector<8x128xf32> -> vector<8x128xf32>
    %cst_57 = arith.constant dense<0.000000e+00> : vector<8x128xf32>
    %198 = tpu.matmul %165, %3, %cst_57 {dimension_numbers = #tpu.dot_dimension_numbers<[1], [0], [0], [1], [0, 0, 1, 1], [], []>} : vector<8x32xf32>, vector<32x128xf32>, vector<8x128xf32> -> vector<8x128xf32>
    %199 = arith.addf %197, %198 : vector<8x128xf32>
    %200 = arith.addf %199, %9 : vector<8x128xf32>
    %201 = arith.negf %200 : vector<8x128xf32>
    %202 = math.exp %201 : vector<8x128xf32>
    %cst_58 = arith.constant 1.000000e+00 : f32
    %203 = vector.broadcast %cst_58 : f32 to vector<8x128xf32>
    %204 = arith.addf %203, %202 : vector<8x128xf32>
    %205 = arith.divf %203, %204 : vector<8x128xf32>
    %206 = vector.extract_strided_slice %205 {offsets = [0, 0], sizes = [8, 32], strides = [1, 1]} : vector<8x128xf32> to vector<8x32xf32>
    %207 = vector.extract_strided_slice %205 {offsets = [0, 32], sizes = [8, 32], strides = [1, 1]} : vector<8x128xf32> to vector<8x32xf32>
    %208 = vector.extract_strided_slice %205 {offsets = [0, 64], sizes = [8, 32], strides = [1, 1]} : vector<8x128xf32> to vector<8x32xf32>
    %209 = vector.extract_strided_slice %205 {offsets = [0, 96], sizes = [8, 32], strides = [1, 1]} : vector<8x128xf32> to vector<8x32xf32>
    %cst_59 = arith.constant 2.000000e+00 : f32
    %210 = vector.broadcast %cst_59 : f32 to vector<8x32xf32>
    %211 = arith.mulf %210, %209 : vector<8x32xf32>
    %cst_60 = arith.constant 1.000000e+00 : f32
    %212 = vector.broadcast %cst_60 : f32 to vector<8x32xf32>
    %213 = arith.subf %211, %212 : vector<8x32xf32>
    %214 = arith.mulf %207, %163 : vector<8x32xf32>
    %215 = arith.mulf %206, %213 : vector<8x32xf32>
    %216 = arith.addf %214, %215 : vector<8x32xf32>
    %217 = math.tanh %216 : vector<8x32xf32>
    %218 = arith.mulf %208, %217 : vector<8x32xf32>
    %219 = arith.index_cast %c3_i32 : i32 to index
    %c0_61 = arith.constant 0 : index
    %c0_62 = arith.constant 0 : index
    %220 = vector.load %arg12[%219, %c0_61, %c0_62] : memref<8x8x32xf32, #tpu.memory_space<vmem>>, vector<1x8x32xf32>
    %221 = vector.shape_cast %220 : vector<1x8x32xf32> to vector<8x32xf32>
    %222 = vector.shape_cast %218 : vector<8x32xf32> to vector<1x8x32xf32>
    tpu.vector_store %arg12[%219, %c0_61, %c0_62], %222 {strides = array<i32>} : memref<8x8x32xf32, #tpu.memory_space<vmem>>, vector<1x8x32xf32>,
    %c4_i32 = arith.constant 4 : i32
    %223 = arith.index_cast %c4_i32 : i32 to index
    %c0_63 = arith.constant 0 : index
    %c0_64 = arith.constant 0 : index
    %224 = vector.load %arg1[%223, %c0_63, %c0_64] : memref<8x8x1xf32, #tpu.memory_space<vmem>>, vector<1x8x1xf32>
    %225 = vector.shape_cast %224 : vector<1x8x1xf32> to vector<8x1xf32>
    %226 = vector.broadcast %225 : vector<8x1xf32> to vector<8x128xf32>
    %227 = vector.broadcast %0 : vector<1x128xf32> to vector<8x128xf32>
    %228 = arith.mulf %226, %227 : vector<8x128xf32>
    %cst_65 = arith.constant dense<0.000000e+00> : vector<8x128xf32>
    %229 = tpu.matmul %196, %1, %cst_65 {dimension_numbers = #tpu.dot_dimension_numbers<[1], [0], [0], [1], [0, 0, 1, 1], [], []>} : vector<8x32xf32>, vector<32x128xf32>, vector<8x128xf32> -> vector<8x128xf32>
    %230 = arith.addf %228, %229 : vector<8x128xf32>
    %231 = arith.addf %230, %6 : vector<8x128xf32>
    %232 = arith.negf %231 : vector<8x128xf32>
    %233 = math.exp %232 : vector<8x128xf32>
    %cst_66 = arith.constant 1.000000e+00 : f32
    %234 = vector.broadcast %cst_66 : f32 to vector<8x128xf32>
    %235 = arith.addf %234, %233 : vector<8x128xf32>
    %236 = arith.divf %234, %235 : vector<8x128xf32>
    %237 = vector.extract_strided_slice %236 {offsets = [0, 0], sizes = [8, 32], strides = [1, 1]} : vector<8x128xf32> to vector<8x32xf32>
    %238 = vector.extract_strided_slice %236 {offsets = [0, 32], sizes = [8, 32], strides = [1, 1]} : vector<8x128xf32> to vector<8x32xf32>
    %239 = vector.extract_strided_slice %236 {offsets = [0, 64], sizes = [8, 32], strides = [1, 1]} : vector<8x128xf32> to vector<8x32xf32>
    %240 = vector.extract_strided_slice %236 {offsets = [0, 96], sizes = [8, 32], strides = [1, 1]} : vector<8x128xf32> to vector<8x32xf32>
    %cst_67 = arith.constant 2.000000e+00 : f32
    %241 = vector.broadcast %cst_67 : f32 to vector<8x32xf32>
    %242 = arith.mulf %241, %240 : vector<8x32xf32>
    %cst_68 = arith.constant 1.000000e+00 : f32
    %243 = vector.broadcast %cst_68 : f32 to vector<8x32xf32>
    %244 = arith.subf %242, %243 : vector<8x32xf32>
    %245 = arith.mulf %238, %194 : vector<8x32xf32>
    %246 = arith.mulf %237, %244 : vector<8x32xf32>
    %247 = arith.addf %245, %246 : vector<8x32xf32>
    %248 = math.tanh %247 : vector<8x32xf32>
    %249 = arith.mulf %239, %248 : vector<8x32xf32>
    %cst_69 = arith.constant dense<0.000000e+00> : vector<8x128xf32>
    %250 = tpu.matmul %249, %2, %cst_69 {dimension_numbers = #tpu.dot_dimension_numbers<[1], [0], [0], [1], [0, 0, 1, 1], [], []>} : vector<8x32xf32>, vector<32x128xf32>, vector<8x128xf32> -> vector<8x128xf32>
    %cst_70 = arith.constant dense<0.000000e+00> : vector<8x128xf32>
    %251 = tpu.matmul %218, %3, %cst_70 {dimension_numbers = #tpu.dot_dimension_numbers<[1], [0], [0], [1], [0, 0, 1, 1], [], []>} : vector<8x32xf32>, vector<32x128xf32>, vector<8x128xf32> -> vector<8x128xf32>
    %252 = arith.addf %250, %251 : vector<8x128xf32>
    %253 = arith.addf %252, %9 : vector<8x128xf32>
    %254 = arith.negf %253 : vector<8x128xf32>
    %255 = math.exp %254 : vector<8x128xf32>
    %cst_71 = arith.constant 1.000000e+00 : f32
    %256 = vector.broadcast %cst_71 : f32 to vector<8x128xf32>
    %257 = arith.addf %256, %255 : vector<8x128xf32>
    %258 = arith.divf %256, %257 : vector<8x128xf32>
    %259 = vector.extract_strided_slice %258 {offsets = [0, 0], sizes = [8, 32], strides = [1, 1]} : vector<8x128xf32> to vector<8x32xf32>
    %260 = vector.extract_strided_slice %258 {offsets = [0, 32], sizes = [8, 32], strides = [1, 1]} : vector<8x128xf32> to vector<8x32xf32>
    %261 = vector.extract_strided_slice %258 {offsets = [0, 64], sizes = [8, 32], strides = [1, 1]} : vector<8x128xf32> to vector<8x32xf32>
    %262 = vector.extract_strided_slice %258 {offsets = [0, 96], sizes = [8, 32], strides = [1, 1]} : vector<8x128xf32> to vector<8x32xf32>
    %cst_72 = arith.constant 2.000000e+00 : f32
    %263 = vector.broadcast %cst_72 : f32 to vector<8x32xf32>
    %264 = arith.mulf %263, %262 : vector<8x32xf32>
    %cst_73 = arith.constant 1.000000e+00 : f32
    %265 = vector.broadcast %cst_73 : f32 to vector<8x32xf32>
    %266 = arith.subf %264, %265 : vector<8x32xf32>
    %267 = arith.mulf %260, %216 : vector<8x32xf32>
    %268 = arith.mulf %259, %266 : vector<8x32xf32>
    %269 = arith.addf %267, %268 : vector<8x32xf32>
    %270 = math.tanh %269 : vector<8x32xf32>
    %271 = arith.mulf %261, %270 : vector<8x32xf32>
    %272 = arith.index_cast %c4_i32 : i32 to index
    %c0_74 = arith.constant 0 : index
    %c0_75 = arith.constant 0 : index
    %273 = vector.load %arg12[%272, %c0_74, %c0_75] : memref<8x8x32xf32, #tpu.memory_space<vmem>>, vector<1x8x32xf32>
    %274 = vector.shape_cast %273 : vector<1x8x32xf32> to vector<8x32xf32>
    %275 = vector.shape_cast %271 : vector<8x32xf32> to vector<1x8x32xf32>
    tpu.vector_store %arg12[%272, %c0_74, %c0_75], %275 {strides = array<i32>} : memref<8x8x32xf32, #tpu.memory_space<vmem>>, vector<1x8x32xf32>,
    %c5_i32 = arith.constant 5 : i32
    %276 = arith.index_cast %c5_i32 : i32 to index
    %c0_76 = arith.constant 0 : index
    %c0_77 = arith.constant 0 : index
    %277 = vector.load %arg1[%276, %c0_76, %c0_77] : memref<8x8x1xf32, #tpu.memory_space<vmem>>, vector<1x8x1xf32>
    %278 = vector.shape_cast %277 : vector<1x8x1xf32> to vector<8x1xf32>
    %279 = vector.broadcast %278 : vector<8x1xf32> to vector<8x128xf32>
    %280 = vector.broadcast %0 : vector<1x128xf32> to vector<8x128xf32>
    %281 = arith.mulf %279, %280 : vector<8x128xf32>
    %cst_78 = arith.constant dense<0.000000e+00> : vector<8x128xf32>
    %282 = tpu.matmul %249, %1, %cst_78 {dimension_numbers = #tpu.dot_dimension_numbers<[1], [0], [0], [1], [0, 0, 1, 1], [], []>} : vector<8x32xf32>, vector<32x128xf32>, vector<8x128xf32> -> vector<8x128xf32>
    %283 = arith.addf %281, %282 : vector<8x128xf32>
    %284 = arith.addf %283, %6 : vector<8x128xf32>
    %285 = arith.negf %284 : vector<8x128xf32>
    %286 = math.exp %285 : vector<8x128xf32>
    %cst_79 = arith.constant 1.000000e+00 : f32
    %287 = vector.broadcast %cst_79 : f32 to vector<8x128xf32>
    %288 = arith.addf %287, %286 : vector<8x128xf32>
    %289 = arith.divf %287, %288 : vector<8x128xf32>
    %290 = vector.extract_strided_slice %289 {offsets = [0, 0], sizes = [8, 32], strides = [1, 1]} : vector<8x128xf32> to vector<8x32xf32>
    %291 = vector.extract_strided_slice %289 {offsets = [0, 32], sizes = [8, 32], strides = [1, 1]} : vector<8x128xf32> to vector<8x32xf32>
    %292 = vector.extract_strided_slice %289 {offsets = [0, 64], sizes = [8, 32], strides = [1, 1]} : vector<8x128xf32> to vector<8x32xf32>
    %293 = vector.extract_strided_slice %289 {offsets = [0, 96], sizes = [8, 32], strides = [1, 1]} : vector<8x128xf32> to vector<8x32xf32>
    %cst_80 = arith.constant 2.000000e+00 : f32
    %294 = vector.broadcast %cst_80 : f32 to vector<8x32xf32>
    %295 = arith.mulf %294, %293 : vector<8x32xf32>
    %cst_81 = arith.constant 1.000000e+00 : f32
    %296 = vector.broadcast %cst_81 : f32 to vector<8x32xf32>
    %297 = arith.subf %295, %296 : vector<8x32xf32>
    %298 = arith.mulf %291, %247 : vector<8x32xf32>
    %299 = arith.mulf %290, %297 : vector<8x32xf32>
    %300 = arith.addf %298, %299 : vector<8x32xf32>
    %301 = math.tanh %300 : vector<8x32xf32>
    %302 = arith.mulf %292, %301 : vector<8x32xf32>
    %cst_82 = arith.constant dense<0.000000e+00> : vector<8x128xf32>
    %303 = tpu.matmul %302, %2, %cst_82 {dimension_numbers = #tpu.dot_dimension_numbers<[1], [0], [0], [1], [0, 0, 1, 1], [], []>} : vector<8x32xf32>, vector<32x128xf32>, vector<8x128xf32> -> vector<8x128xf32>
    %cst_83 = arith.constant dense<0.000000e+00> : vector<8x128xf32>
    %304 = tpu.matmul %271, %3, %cst_83 {dimension_numbers = #tpu.dot_dimension_numbers<[1], [0], [0], [1], [0, 0, 1, 1], [], []>} : vector<8x32xf32>, vector<32x128xf32>, vector<8x128xf32> -> vector<8x128xf32>
    %305 = arith.addf %303, %304 : vector<8x128xf32>
    %306 = arith.addf %305, %9 : vector<8x128xf32>
    %307 = arith.negf %306 : vector<8x128xf32>
    %308 = math.exp %307 : vector<8x128xf32>
    %cst_84 = arith.constant 1.000000e+00 : f32
    %309 = vector.broadcast %cst_84 : f32 to vector<8x128xf32>
    %310 = arith.addf %309, %308 : vector<8x128xf32>
    %311 = arith.divf %309, %310 : vector<8x128xf32>
    %312 = vector.extract_strided_slice %311 {offsets = [0, 0], sizes = [8, 32], strides = [1, 1]} : vector<8x128xf32> to vector<8x32xf32>
    %313 = vector.extract_strided_slice %311 {offsets = [0, 32], sizes = [8, 32], strides = [1, 1]} : vector<8x128xf32> to vector<8x32xf32>
    %314 = vector.extract_strided_slice %311 {offsets = [0, 64], sizes = [8, 32], strides = [1, 1]} : vector<8x128xf32> to vector<8x32xf32>
    %315 = vector.extract_strided_slice %311 {offsets = [0, 96], sizes = [8, 32], strides = [1, 1]} : vector<8x128xf32> to vector<8x32xf32>
    %cst_85 = arith.constant 2.000000e+00 : f32
    %316 = vector.broadcast %cst_85 : f32 to vector<8x32xf32>
    %317 = arith.mulf %316, %315 : vector<8x32xf32>
    %cst_86 = arith.constant 1.000000e+00 : f32
    %318 = vector.broadcast %cst_86 : f32 to vector<8x32xf32>
    %319 = arith.subf %317, %318 : vector<8x32xf32>
    %320 = arith.mulf %313, %269 : vector<8x32xf32>
    %321 = arith.mulf %312, %319 : vector<8x32xf32>
    %322 = arith.addf %320, %321 : vector<8x32xf32>
    %323 = math.tanh %322 : vector<8x32xf32>
    %324 = arith.mulf %314, %323 : vector<8x32xf32>
    %325 = arith.index_cast %c5_i32 : i32 to index
    %c0_87 = arith.constant 0 : index
    %c0_88 = arith.constant 0 : index
    %326 = vector.load %arg12[%325, %c0_87, %c0_88] : memref<8x8x32xf32, #tpu.memory_space<vmem>>, vector<1x8x32xf32>
    %327 = vector.shape_cast %326 : vector<1x8x32xf32> to vector<8x32xf32>
    %328 = vector.shape_cast %324 : vector<8x32xf32> to vector<1x8x32xf32>
    tpu.vector_store %arg12[%325, %c0_87, %c0_88], %328 {strides = array<i32>} : memref<8x8x32xf32, #tpu.memory_space<vmem>>, vector<1x8x32xf32>,
    %c6_i32 = arith.constant 6 : i32
    %329 = arith.index_cast %c6_i32 : i32 to index
    %c0_89 = arith.constant 0 : index
    %c0_90 = arith.constant 0 : index
    %330 = vector.load %arg1[%329, %c0_89, %c0_90] : memref<8x8x1xf32, #tpu.memory_space<vmem>>, vector<1x8x1xf32>
    %331 = vector.shape_cast %330 : vector<1x8x1xf32> to vector<8x1xf32>
    %332 = vector.broadcast %331 : vector<8x1xf32> to vector<8x128xf32>
    %333 = vector.broadcast %0 : vector<1x128xf32> to vector<8x128xf32>
    %334 = arith.mulf %332, %333 : vector<8x128xf32>
    %cst_91 = arith.constant dense<0.000000e+00> : vector<8x128xf32>
    %335 = tpu.matmul %302, %1, %cst_91 {dimension_numbers = #tpu.dot_dimension_numbers<[1], [0], [0], [1], [0, 0, 1, 1], [], []>} : vector<8x32xf32>, vector<32x128xf32>, vector<8x128xf32> -> vector<8x128xf32>
    %336 = arith.addf %334, %335 : vector<8x128xf32>
    %337 = arith.addf %336, %6 : vector<8x128xf32>
    %338 = arith.negf %337 : vector<8x128xf32>
    %339 = math.exp %338 : vector<8x128xf32>
    %cst_92 = arith.constant 1.000000e+00 : f32
    %340 = vector.broadcast %cst_92 : f32 to vector<8x128xf32>
    %341 = arith.addf %340, %339 : vector<8x128xf32>
    %342 = arith.divf %340, %341 : vector<8x128xf32>
    %343 = vector.extract_strided_slice %342 {offsets = [0, 0], sizes = [8, 32], strides = [1, 1]} : vector<8x128xf32> to vector<8x32xf32>
    %344 = vector.extract_strided_slice %342 {offsets = [0, 32], sizes = [8, 32], strides = [1, 1]} : vector<8x128xf32> to vector<8x32xf32>
    %345 = vector.extract_strided_slice %342 {offsets = [0, 64], sizes = [8, 32], strides = [1, 1]} : vector<8x128xf32> to vector<8x32xf32>
    %346 = vector.extract_strided_slice %342 {offsets = [0, 96], sizes = [8, 32], strides = [1, 1]} : vector<8x128xf32> to vector<8x32xf32>
    %cst_93 = arith.constant 2.000000e+00 : f32
    %347 = vector.broadcast %cst_93 : f32 to vector<8x32xf32>
    %348 = arith.mulf %347, %346 : vector<8x32xf32>
    %cst_94 = arith.constant 1.000000e+00 : f32
    %349 = vector.broadcast %cst_94 : f32 to vector<8x32xf32>
    %350 = arith.subf %348, %349 : vector<8x32xf32>
    %351 = arith.mulf %344, %300 : vector<8x32xf32>
    %352 = arith.mulf %343, %350 : vector<8x32xf32>
    %353 = arith.addf %351, %352 : vector<8x32xf32>
    %354 = math.tanh %353 : vector<8x32xf32>
    %355 = arith.mulf %345, %354 : vector<8x32xf32>
    %cst_95 = arith.constant dense<0.000000e+00> : vector<8x128xf32>
    %356 = tpu.matmul %355, %2, %cst_95 {dimension_numbers = #tpu.dot_dimension_numbers<[1], [0], [0], [1], [0, 0, 1, 1], [], []>} : vector<8x32xf32>, vector<32x128xf32>, vector<8x128xf32> -> vector<8x128xf32>
    %cst_96 = arith.constant dense<0.000000e+00> : vector<8x128xf32>
    %357 = tpu.matmul %324, %3, %cst_96 {dimension_numbers = #tpu.dot_dimension_numbers<[1], [0], [0], [1], [0, 0, 1, 1], [], []>} : vector<8x32xf32>, vector<32x128xf32>, vector<8x128xf32> -> vector<8x128xf32>
    %358 = arith.addf %356, %357 : vector<8x128xf32>
    %359 = arith.addf %358, %9 : vector<8x128xf32>
    %360 = arith.negf %359 : vector<8x128xf32>
    %361 = math.exp %360 : vector<8x128xf32>
    %cst_97 = arith.constant 1.000000e+00 : f32
    %362 = vector.broadcast %cst_97 : f32 to vector<8x128xf32>
    %363 = arith.addf %362, %361 : vector<8x128xf32>
    %364 = arith.divf %362, %363 : vector<8x128xf32>
    %365 = vector.extract_strided_slice %364 {offsets = [0, 0], sizes = [8, 32], strides = [1, 1]} : vector<8x128xf32> to vector<8x32xf32>
    %366 = vector.extract_strided_slice %364 {offsets = [0, 32], sizes = [8, 32], strides = [1, 1]} : vector<8x128xf32> to vector<8x32xf32>
    %367 = vector.extract_strided_slice %364 {offsets = [0, 64], sizes = [8, 32], strides = [1, 1]} : vector<8x128xf32> to vector<8x32xf32>
    %368 = vector.extract_strided_slice %364 {offsets = [0, 96], sizes = [8, 32], strides = [1, 1]} : vector<8x128xf32> to vector<8x32xf32>
    %cst_98 = arith.constant 2.000000e+00 : f32
    %369 = vector.broadcast %cst_98 : f32 to vector<8x32xf32>
    %370 = arith.mulf %369, %368 : vector<8x32xf32>
    %cst_99 = arith.constant 1.000000e+00 : f32
    %371 = vector.broadcast %cst_99 : f32 to vector<8x32xf32>
    %372 = arith.subf %370, %371 : vector<8x32xf32>
    %373 = arith.mulf %366, %322 : vector<8x32xf32>
    %374 = arith.mulf %365, %372 : vector<8x32xf32>
    %375 = arith.addf %373, %374 : vector<8x32xf32>
    %376 = math.tanh %375 : vector<8x32xf32>
    %377 = arith.mulf %367, %376 : vector<8x32xf32>
    %378 = arith.index_cast %c6_i32 : i32 to index
    %c0_100 = arith.constant 0 : index
    %c0_101 = arith.constant 0 : index
    %379 = vector.load %arg12[%378, %c0_100, %c0_101] : memref<8x8x32xf32, #tpu.memory_space<vmem>>, vector<1x8x32xf32>
    %380 = vector.shape_cast %379 : vector<1x8x32xf32> to vector<8x32xf32>
    %381 = vector.shape_cast %377 : vector<8x32xf32> to vector<1x8x32xf32>
    tpu.vector_store %arg12[%378, %c0_100, %c0_101], %381 {strides = array<i32>} : memref<8x8x32xf32, #tpu.memory_space<vmem>>, vector<1x8x32xf32>,
    %c7_i32 = arith.constant 7 : i32
    %382 = arith.index_cast %c7_i32 : i32 to index
    %c0_102 = arith.constant 0 : index
    %c0_103 = arith.constant 0 : index
    %383 = vector.load %arg1[%382, %c0_102, %c0_103] : memref<8x8x1xf32, #tpu.memory_space<vmem>>, vector<1x8x1xf32>
    %384 = vector.shape_cast %383 : vector<1x8x1xf32> to vector<8x1xf32>
    %385 = vector.broadcast %384 : vector<8x1xf32> to vector<8x128xf32>
    %386 = vector.broadcast %0 : vector<1x128xf32> to vector<8x128xf32>
    %387 = arith.mulf %385, %386 : vector<8x128xf32>
    %cst_104 = arith.constant dense<0.000000e+00> : vector<8x128xf32>
    %388 = tpu.matmul %355, %1, %cst_104 {dimension_numbers = #tpu.dot_dimension_numbers<[1], [0], [0], [1], [0, 0, 1, 1], [], []>} : vector<8x32xf32>, vector<32x128xf32>, vector<8x128xf32> -> vector<8x128xf32>
    %389 = arith.addf %387, %388 : vector<8x128xf32>
    %390 = arith.addf %389, %6 : vector<8x128xf32>
    %391 = arith.negf %390 : vector<8x128xf32>
    %392 = math.exp %391 : vector<8x128xf32>
    %cst_105 = arith.constant 1.000000e+00 : f32
    %393 = vector.broadcast %cst_105 : f32 to vector<8x128xf32>
    %394 = arith.addf %393, %392 : vector<8x128xf32>
    %395 = arith.divf %393, %394 : vector<8x128xf32>
    %396 = vector.extract_strided_slice %395 {offsets = [0, 0], sizes = [8, 32], strides = [1, 1]} : vector<8x128xf32> to vector<8x32xf32>
    %397 = vector.extract_strided_slice %395 {offsets = [0, 32], sizes = [8, 32], strides = [1, 1]} : vector<8x128xf32> to vector<8x32xf32>
    %398 = vector.extract_strided_slice %395 {offsets = [0, 64], sizes = [8, 32], strides = [1, 1]} : vector<8x128xf32> to vector<8x32xf32>
    %399 = vector.extract_strided_slice %395 {offsets = [0, 96], sizes = [8, 32], strides = [1, 1]} : vector<8x128xf32> to vector<8x32xf32>
    %cst_106 = arith.constant 2.000000e+00 : f32
    %400 = vector.broadcast %cst_106 : f32 to vector<8x32xf32>
    %401 = arith.mulf %400, %399 : vector<8x32xf32>
    %cst_107 = arith.constant 1.000000e+00 : f32
    %402 = vector.broadcast %cst_107 : f32 to vector<8x32xf32>
    %403 = arith.subf %401, %402 : vector<8x32xf32>
    %404 = arith.mulf %397, %353 : vector<8x32xf32>
    %405 = arith.mulf %396, %403 : vector<8x32xf32>
    %406 = arith.addf %404, %405 : vector<8x32xf32>
    %407 = math.tanh %406 : vector<8x32xf32>
    %408 = arith.mulf %398, %407 : vector<8x32xf32>
    %cst_108 = arith.constant dense<0.000000e+00> : vector<8x128xf32>
    %409 = tpu.matmul %408, %2, %cst_108 {dimension_numbers = #tpu.dot_dimension_numbers<[1], [0], [0], [1], [0, 0, 1, 1], [], []>} : vector<8x32xf32>, vector<32x128xf32>, vector<8x128xf32> -> vector<8x128xf32>
    %cst_109 = arith.constant dense<0.000000e+00> : vector<8x128xf32>
    %410 = tpu.matmul %377, %3, %cst_109 {dimension_numbers = #tpu.dot_dimension_numbers<[1], [0], [0], [1], [0, 0, 1, 1], [], []>} : vector<8x32xf32>, vector<32x128xf32>, vector<8x128xf32> -> vector<8x128xf32>
    %411 = arith.addf %409, %410 : vector<8x128xf32>
    %412 = arith.addf %411, %9 : vector<8x128xf32>
    %413 = arith.negf %412 : vector<8x128xf32>
    %414 = math.exp %413 : vector<8x128xf32>
    %cst_110 = arith.constant 1.000000e+00 : f32
    %415 = vector.broadcast %cst_110 : f32 to vector<8x128xf32>
    %416 = arith.addf %415, %414 : vector<8x128xf32>
    %417 = arith.divf %415, %416 : vector<8x128xf32>
    %418 = vector.extract_strided_slice %417 {offsets = [0, 0], sizes = [8, 32], strides = [1, 1]} : vector<8x128xf32> to vector<8x32xf32>
    %419 = vector.extract_strided_slice %417 {offsets = [0, 32], sizes = [8, 32], strides = [1, 1]} : vector<8x128xf32> to vector<8x32xf32>
    %420 = vector.extract_strided_slice %417 {offsets = [0, 64], sizes = [8, 32], strides = [1, 1]} : vector<8x128xf32> to vector<8x32xf32>
    %421 = vector.extract_strided_slice %417 {offsets = [0, 96], sizes = [8, 32], strides = [1, 1]} : vector<8x128xf32> to vector<8x32xf32>
    %cst_111 = arith.constant 2.000000e+00 : f32
    %422 = vector.broadcast %cst_111 : f32 to vector<8x32xf32>
    %423 = arith.mulf %422, %421 : vector<8x32xf32>
    %cst_112 = arith.constant 1.000000e+00 : f32
    %424 = vector.broadcast %cst_112 : f32 to vector<8x32xf32>
    %425 = arith.subf %423, %424 : vector<8x32xf32>
    %426 = arith.mulf %419, %375 : vector<8x32xf32>
    %427 = arith.mulf %418, %425 : vector<8x32xf32>
    %428 = arith.addf %426, %427 : vector<8x32xf32>
    %429 = math.tanh %428 : vector<8x32xf32>
    %430 = arith.mulf %420, %429 : vector<8x32xf32>
    %431 = arith.index_cast %c7_i32 : i32 to index
    %c0_113 = arith.constant 0 : index
    %c0_114 = arith.constant 0 : index
    %432 = vector.load %arg12[%431, %c0_113, %c0_114] : memref<8x8x32xf32, #tpu.memory_space<vmem>>, vector<1x8x32xf32>
    %433 = vector.shape_cast %432 : vector<1x8x32xf32> to vector<8x32xf32>
    %434 = vector.shape_cast %430 : vector<8x32xf32> to vector<1x8x32xf32>
    tpu.vector_store %arg12[%431, %c0_113, %c0_114], %434 {strides = array<i32>} : memref<8x8x32xf32, #tpu.memory_space<vmem>>, vector<1x8x32xf32>,
    %c8_i32 = arith.constant 8 : i32
    %c0_115 = arith.constant 0 : index
    %c0_116 = arith.constant 0 : index
    %c0_117 = arith.constant 0 : index
    %435 = vector.load %arg12[%c0_115, %c0_116, %c0_117] : memref<8x8x32xf32, #tpu.memory_space<vmem>>, vector<1x8x32xf32>
    %436 = vector.shape_cast %435 : vector<1x8x32xf32> to vector<8x32xf32>
    %c1 = arith.constant 1 : index
    %c0_118 = arith.constant 0 : index
    %c0_119 = arith.constant 0 : index
    %437 = vector.load %arg12[%c1, %c0_118, %c0_119] : memref<8x8x32xf32, #tpu.memory_space<vmem>>, vector<1x8x32xf32>
    %438 = vector.shape_cast %437 : vector<1x8x32xf32> to vector<8x32xf32>
    %c2 = arith.constant 2 : index
    %c0_120 = arith.constant 0 : index
    %c0_121 = arith.constant 0 : index
    %439 = vector.load %arg12[%c2, %c0_120, %c0_121] : memref<8x8x32xf32, #tpu.memory_space<vmem>>, vector<1x8x32xf32>
    %440 = vector.shape_cast %439 : vector<1x8x32xf32> to vector<8x32xf32>
    %c3 = arith.constant 3 : index
    %c0_122 = arith.constant 0 : index
    %c0_123 = arith.constant 0 : index
    %441 = vector.load %arg12[%c3, %c0_122, %c0_123] : memref<8x8x32xf32, #tpu.memory_space<vmem>>, vector<1x8x32xf32>
    %442 = vector.shape_cast %441 : vector<1x8x32xf32> to vector<8x32xf32>
    %c4 = arith.constant 4 : index
    %c0_124 = arith.constant 0 : index
    %c0_125 = arith.constant 0 : index
    %443 = vector.load %arg12[%c4, %c0_124, %c0_125] : memref<8x8x32xf32, #tpu.memory_space<vmem>>, vector<1x8x32xf32>
    %444 = vector.shape_cast %443 : vector<1x8x32xf32> to vector<8x32xf32>
    %c5 = arith.constant 5 : index
    %c0_126 = arith.constant 0 : index
    %c0_127 = arith.constant 0 : index
    %445 = vector.load %arg12[%c5, %c0_126, %c0_127] : memref<8x8x32xf32, #tpu.memory_space<vmem>>, vector<1x8x32xf32>
    %446 = vector.shape_cast %445 : vector<1x8x32xf32> to vector<8x32xf32>
    %c6 = arith.constant 6 : index
    %c0_128 = arith.constant 0 : index
    %c0_129 = arith.constant 0 : index
    %447 = vector.load %arg12[%c6, %c0_128, %c0_129] : memref<8x8x32xf32, #tpu.memory_space<vmem>>, vector<1x8x32xf32>
    %448 = vector.shape_cast %447 : vector<1x8x32xf32> to vector<8x32xf32>
    %c7 = arith.constant 7 : index
    %c0_130 = arith.constant 0 : index
    %c0_131 = arith.constant 0 : index
    %449 = vector.load %arg12[%c7, %c0_130, %c0_131] : memref<8x8x32xf32, #tpu.memory_space<vmem>>, vector<1x8x32xf32>
    %450 = vector.shape_cast %449 : vector<1x8x32xf32> to vector<8x32xf32>
    %451 = tpu.concatenate %436, %438, %440, %442, %444, %446, %448, %450 in 1 : vector<8x32xf32>, vector<8x32xf32>, vector<8x32xf32>, vector<8x32xf32>, vector<8x32xf32>, vector<8x32xf32>, vector<8x32xf32>, vector<8x32xf32> -> vector<8x256xf32>
    %c0_132 = arith.constant 0 : index
    %c0_133 = arith.constant 0 : index
    %452 = vector.load %arg8[%c0_132, %c0_133] : memref<256x16xf32, #tpu.memory_space<vmem>>, vector<256x16xf32>
    %cst_134 = arith.constant dense<0.000000e+00> : vector<8x16xf32>
    %453 = tpu.matmul %451, %452, %cst_134 {dimension_numbers = #tpu.dot_dimension_numbers<[1], [0], [0], [1], [0, 0, 1, 1], [], []>} : vector<8x256xf32>, vector<256x16xf32>, vector<8x16xf32> -> vector<8x16xf32>
    %c0_135 = arith.constant 0 : index
    %c0_136 = arith.constant 0 : index
    %454 = vector.load %arg9[%c0_135, %c0_136] : memref<1x16xf32, #tpu.memory_space<vmem>>, vector<1x16xf32>
    %455 = vector.broadcast %454 : vector<1x16xf32> to vector<8x16xf32>
    %456 = arith.addf %453, %455 : vector<8x16xf32>
    %457 = vector.extract_strided_slice %456 {offsets = [0, 0], sizes = [8, 8], strides = [1, 1]} : vector<8x16xf32> to vector<8x8xf32>
    %c0_137 = arith.constant 0 : index
    %c0_138 = arith.constant 0 : index
    %458 = vector.load %arg10[%c0_137, %c0_138] : memref<8x8xf32, #tpu.memory_space<vmem>>, vector<8x8xf32>
    tpu.vector_store %arg10[%c0_137, %c0_138], %457 {strides = array<i32>} : memref<8x8xf32, #tpu.memory_space<vmem>>, vector<8x8xf32>,
    %459 = vector.extract_strided_slice %456 {offsets = [0, 8], sizes = [8, 8], strides = [1, 1]} : vector<8x16xf32> to vector<8x8xf32>
    %cst_139 = arith.constant 0.000000e+00 : f32
    %460 = vector.broadcast %cst_139 : f32 to vector<8x8xf32>
    %461 = arith.maximumf %459, %460 : vector<8x8xf32>
    %462 = vector.broadcast %cst_139 : f32 to vector<8x8xf32>
    %463 = arith.subf %459, %462 : vector<8x8xf32>
    %464 = arith.cmpf one, %463, %463 : vector<8x8xf32>
    %465 = vector.broadcast %cst_139 : f32 to vector<8x8xf32>
    %466 = arith.addf %459, %465 : vector<8x8xf32>
    %467 = math.absf %463 : vector<8x8xf32>
    %cst_140 = arith.constant 0.000000e+00 : f32
    %468 = vector.broadcast %cst_140 : f32 to vector<8x8xf32>
    %469 = arith.subf %468, %467 : vector<8x8xf32>
    %470 = math.exp %469 : vector<8x8xf32>
    %471 = math.log1p %470 : vector<8x8xf32>
    %472 = arith.addf %461, %471 : vector<8x8xf32>
    %473 = arith.select %464, %466, %472 : vector<8x8xi1>, vector<8x8xf32>
    %cst_141 = arith.constant 1.000000e-03 : f32
    %474 = vector.broadcast %cst_141 : f32 to vector<8x8xf32>
    %475 = arith.addf %473, %474 : vector<8x8xf32>
    %c0_142 = arith.constant 0 : index
    %c0_143 = arith.constant 0 : index
    %476 = vector.load %arg11[%c0_142, %c0_143] : memref<8x8xf32, #tpu.memory_space<vmem>>, vector<8x8xf32>
    tpu.vector_store %arg11[%c0_142, %c0_143], %475 {strides = array<i32>} : memref<8x8xf32, #tpu.memory_space<vmem>>, vector<8x8xf32>,
    return
  }
  func.func @transform_0(%arg0: i32) -> (i32, i32, i32) {
    %c0_i32 = arith.constant 0 : i32
    %c0_i32_0 = arith.constant 0 : i32
    %c0_i32_1 = arith.constant 0 : i32
    return %c0_i32, %arg0, %c0_i32_0 : i32, i32, i32
  }
  func.func @transform_1(%arg0: i32) -> (i32, i32) {
    %c0_i32 = arith.constant 0 : i32
    %c0_i32_0 = arith.constant 0 : i32
    %c0_i32_1 = arith.constant 0 : i32
    return %c0_i32, %c0_i32_0 : i32, i32
  }
  func.func @transform_2(%arg0: i32) -> (i32, i32) {
    %c0_i32 = arith.constant 0 : i32
    %c0_i32_0 = arith.constant 0 : i32
    %c0_i32_1 = arith.constant 0 : i32
    return %c0_i32, %c0_i32_0 : i32, i32
  }
  func.func @transform_3(%arg0: i32) -> (i32, i32) {
    %c0_i32 = arith.constant 0 : i32
    %c0_i32_0 = arith.constant 0 : i32
    %c0_i32_1 = arith.constant 0 : i32
    return %c0_i32, %c0_i32_0 : i32, i32
  }
  func.func @transform_4(%arg0: i32) -> (i32, i32) {
    %c0_i32 = arith.constant 0 : i32
    %c0_i32_0 = arith.constant 0 : i32
    %c0_i32_1 = arith.constant 0 : i32
    return %c0_i32, %c0_i32_0 : i32, i32
  }
  func.func @transform_5(%arg0: i32) -> (i32, i32) {
    %c0_i32 = arith.constant 0 : i32
    %c0_i32_0 = arith.constant 0 : i32
    %c0_i32_1 = arith.constant 0 : i32
    return %c0_i32, %c0_i32_0 : i32, i32
  }
  func.func @transform_6(%arg0: i32) -> (i32, i32) {
    %c0_i32 = arith.constant 0 : i32
    %c0_i32_0 = arith.constant 0 : i32
    %c0_i32_1 = arith.constant 0 : i32
    return %c0_i32, %c0_i32_0 : i32, i32
  }
  func.func @transform_7(%arg0: i32) -> (i32, i32) {
    %c0_i32 = arith.constant 0 : i32
    %c0_i32_0 = arith.constant 0 : i32
    %c0_i32_1 = arith.constant 0 : i32
    return %c0_i32, %c0_i32_0 : i32, i32
  }
  func.func @transform_8(%arg0: i32) -> (i32, i32) {
    %c0_i32 = arith.constant 0 : i32
    %c0_i32_0 = arith.constant 0 : i32
    %c0_i32_1 = arith.constant 0 : i32
    return %c0_i32, %c0_i32_0 : i32, i32
  }
  func.func @transform_9(%arg0: i32) -> (i32, i32) {
    %c0_i32 = arith.constant 0 : i32
    %c0_i32_0 = arith.constant 0 : i32
    return %arg0, %c0_i32 : i32, i32
  }
  func.func @transform_10(%arg0: i32) -> (i32, i32) {
    %c0_i32 = arith.constant 0 : i32
    %c0_i32_0 = arith.constant 0 : i32
    return %arg0, %c0_i32 : i32, i32
  }
}

</mosaic_0001>

<bundles_post_ra>
// kernel: deepar_forward.1
= control target key start
LH: loop header
LB: loop body
LE: loop exit
PB: predicated region body
PF: predicated region fallthrough
CT: control target
= control target key end

     0   :  { %16 = vsyncpa [#allocation4], 0  ;;  %v3382_v3 = vmov 0.0|0.0   ;;  %vm3383_vm0 = vmmov 0   ;;  %v3384_v6 = vmov 0.0   ;;  %s3985_s0 = inlined_call_operand.vmem [shape: f32[8,8,1], index: 0, kind: input, shape index: {}]   ;;  %s3986_s1 = inlined_call_operand.vmem [shape: f32[1,128], index: 1, kind: input, shape index: {}]   ;;  %s3987_s2 = inlined_call_operand.vmem [shape: f32[32,128], index: 2, kind: input, shape index: {}]   ;;  %s3988_s3 = inlined_call_operand.vmem [shape: f32[1,128], index: 3, kind: input, shape index: {}]   ;;  %s3989_s4 = inlined_call_operand.vmem [shape: f32[32,128], index: 4, kind: input, shape index: {}]   ;;  %s3990_s5 = inlined_call_operand.vmem [shape: f32[32,128], index: 5, kind: input, shape index: {}]   ;;  %s3991_s6 = inlined_call_operand.vmem [shape: f32[1,128], index: 6, kind: input, shape index: {}]   ;;  %s3992_s7 = inlined_call_operand.vmem [shape: f32[256,16], index: 7, kind: input, shape index: {}]   ;;  %s3993_s8 = inlined_call_operand.vmem [shape: f32[1,16], index: 8, kind: input, shape index: {}]   ;;  %s3994_s9 = inlined_call_operand.hbm [shape: f32[8,8], index: 9, kind: output, shape index: {0}]   ;;  %s3995_s10 = inlined_call_operand.hbm [shape: f32[8,8], index: 10, kind: output, shape index: {1}]  }
   0x1   :  { %v37_v0 = vld [vmem:[%s3987_s2] sm:$0xff]  ;;  %v38_v1 = vld [vmem:[%s3987_s2 + $0x8] sm:$0xff]  ;;  %v39_v2 = vld [vmem:[%s3987_s2 + $0x10] sm:$0xff]  ;;  %3028 = vmatprep.subr.bf16.mxu1 %v3382_v3  ;;  %2772 = vmatprep.mubr.msk.f32.mxu1 %vm3383_vm0, %v3384_v6 }
   0x2   :  { %v3457_v4 = vpack.c.bf16 %v38_v1, %v37_v0  ;;  %v40_v5 = vld [vmem:[%s3987_s2 + $0x18] sm:$0xff]  ;;  %v63_v7 = vld [vmem:[%s3985_s0] sm:$0xff] }
   0x3   :  { %17 = vsyncpa [#allocation6], 0  ;;  %v3385_v8 = vmov 0   ;;  %v3468_v9 = vpack.c.bf16 %v40_v5, %v39_v2  ;;  %3052 = vmatprep.subr.bf16.mxu0 %v3382_v3  ;;  %2816 = vmatprep.mubr.msk.f32.mxu0 %vm3383_vm0, %v3384_v6  ;;  %v3482_v11 = vld [vmem:[%s3986_s1] ss:$0 sm:$0xff]  ;;  %s3386_s26 = smov 32  }
   0x4   :  { %3214 = vset.pattern.permute.xlu0 %v3385_v8  ;;  %3215 = vset.pattern.permute.xlu1 %v3385_v8  ;;  %v3488_v13 = vld [vmem:[%s3988_s3] ss:$0 sm:$0xff]  ;;  %v46_v30 = vld [vmem:[%s3990_s5 + $0x8] sm:$0xff]  ;;  %v47_v31 = vld [vmem:[%s3990_s5 + $0x10] sm:$0xff]  ;;  %s3387_s2 = smov 64   ;;  %vm76_vm1 = vcmask 261120  }
   0x5   :  { %3030 = vmatpush3.bf16.msra.mxu1 %v3457_v4  ;;  %66 = vperm.xlu0 %3214, %v63_v7   ;;  %v45_v29 = vld [vmem:[%s3990_s5] sm:$0xff]  ;;  %v48_v33 = vld [vmem:[%s3990_s5 + $0x18] sm:$0xff]  ;;  %v42_v36 = vld [vmem:[%s3989_s4 + $0x8] sm:$0xff]  ;;  %s3388_s28 = smov 96   ;;  %vm2374_vm2 = vcmask 523264   ;;  %vm2376_vm3 = vcmask 785408  }
   0x6   :  { %3031 = vmatprep.subr.bf16.mxu1 %v3382_v3  ;;  %v3505_v32 = vpack.c.bf16 %v46_v30, %v45_v29  ;;  %v3511_v34 = vpack.c.bf16 %v48_v33, %v47_v31  ;;  %v41_v35 = vld [vmem:[%s3989_s4] sm:$0xff]  ;;  %v43_v38 = vld [vmem:[%s3989_s4 + $0x10] sm:$0xff]  ;;  %v44_v39 = vld [vmem:[%s3989_s4 + $0x18] sm:$0xff]  ;;  %vm2490_vm4 = vcmask 64512   ;;  %s3389_s30 = smov [#allocation3]  }
   0x7   :  { %v3523_v37 = vpack.c.bf16 %v42_v36, %v41_v35  ;;  %v3537_v41 = vpack.c.bf16 %v44_v39, %v43_v38  ;;  %v2552_v42 = vld [vmem:[%s3985_s0 + $0x8] sm:$0xff]  ;;  %v3565_v48 = vld [vmem:[%s3991_s6] ss:$0 sm:$0xff]  ;;  %s2522_s11 = sshll.u32 %s3389_s30, 4  ;;  %s2523_s11 = int_to_ptr.vmem [resolvable:$true] %s2522_s11 }
   0x8   :  { %3054 = vmatpush3.bf16.msra.mxu0 %v3505_v32  ;;  %s3334_s12 = scalar_lea.vmem %s2523_s11, 128  ;;  %p3339_p1 = scmp.lt.s32.totalorder %s2523_s11, %s2523_s11 }
   0x9   :  { %3033 = vmatpush3.bf16.msra.mxu1 %v3468_v9  ;;  %3055 = vmatprep.subr.bf16.mxu0 %v3382_v3  ;;  %p3335_p0 = scmp.ne.s32.totalorder %s2523_s11, %s3334_s12  ;;  %p3340_p2 = scmp.lt.s32.totalorder %s3334_s12, %s3334_s12 }
   0xa   :  { %3034 = vmatprep.subr.bf16.mxu1 %v3382_v3 }
   0xb   :  { %p3341_p3 = por %p3340_p2, %p3339_p1 }
   0xc   :  { %2773 = vmatmul.mubr.f32.vlgmr.msra.gmra.mrb[0].mxu1 %v3384_v6  ;;  %3057 = vmatpush3.bf16.msra.mxu0 %v3511_v34 }
   0xd   :  { %2783 = vmatprep.mubr.msk.f32.mxu1 %vm3383_vm0, %v3384_v6  ;;  %3036 = vmatpush3.bf16.msra.mxu1 %v3505_v32  ;;  %p3342_p4 = pnand %p3341_p3, %p3335_p0 }
   0xe   :  { %3037 = vmatprep.subr.bf16.mxu1 %v3382_v3  ;;  %3064 = vmatprep.subr.bf16.mxu0 %v3382_v3 }
  0x11   :  { %3039 = vmatpush3.bf16.msra.mxu1 %v3511_v34 }
  0x12   :  { %3040 = vmatprep.subr.bf16.mxu1 %v3382_v3 }
  0x14   :  { %2784 = vmatmul.mubr.f32.vlgmr.msra.gmra.mrb[2].mxu1 %v3384_v6 }
  0x15   :  { %3042 = vmatpush3.bf16.msra.mxu1 %v3523_v37  ;;  %2794 = vmatprep.mubr.msk.f32.mxu1 %vm3383_vm0, %v3384_v6 }
  0x16   :  { %3043 = vmatprep.subr.bf16.mxu1 %v3382_v3 }
  0x19   :  { %3045 = vmatpush3.bf16.msra.mxu1 %v3537_v41 }
  0x1a   :  { %3046 = vmatprep.subr.bf16.mxu1 %v3382_v3 }
  0x84   :  { %v67_v10 = vpop.permute.xlu0 %66 }
  0x85   :  { %v75_v12 = vmul.f32 %v3482_v11, %v67_v10 }
  0xdf   :  { %v146_v14 = vpop.f32.mrb[0].mxu1 }
  0xe0   :  { %v150_v15 = vadd.f32 %v146_v14, %v75_v12  ;;  %v2774_v16 = vpop.f32.mrb[1].mxu1 }
  0xe2   :  { %v151_v17 = vadd.f32 %v3488_v13, %v150_v15 }
  0xe4   :  { %v2547_v18 = vmul.f32 -1.442695, %v151_v17 }
  0xe6   :  { %3231 = vpow2.f32 %v2547_v18 }
  0xe7   :  { %v243_v45 = vpop.f32.mrb[2].mxu1 }
  0xe8   :  { %v2785_v46 = vpop.f32.mrb[3].mxu1 }
  0xf0   :  { %v3232_v19 = vpop.eup %3231 }
  0xf1   :  { %v155_v20 = vadd.f32 1.0, %v3232_v19 }
  0xf3   :  { %3233 = vrcp.f32 %v155_v20 }
  0xfd   :  { %v3234_v21 = vpop.eup %3233 }
  0xfe   :  { %v158_v22 = vmul.f32 2.0, %v3234_v21  ;;  %v160_v26 = vmul.f32 0.0, %v3234_v21 }
 0x100   :  { %v2548_v23 = vadd.f32 -1.0, %v158_v22 }
 0x102   :  { %162 = vrot.lane.b32.xlu0 %v2548_v23, %s3386_s26 }
 0x174   :  { %v163_v24 = vpop.permute.xlu0 %162 }
 0x175   :  { %v165_v25 = vmul.f32 %v3234_v21, %v163_v24 }
 0x177   :  { %167 = vrot.lane.b32.xlu1 %v165_v25, %s3386_s26 }
 0x1e9   :  { %v168_v27 = vpop.permute.xlu1 %167 }
 0x1ea   :  { %v3493_v28 = vadd.f32 %v168_v27, %v160_v26  ;;  %v2560_v27 = vld [vmem:[%s3985_s0 + $0x10] sm:$0xff] }
 0x1ec   :  { %3235 = vtanh.f32 %v3493_v28 }
 0x1f6   :  { %v3236_v40 = vpop.eup %3235 }
 0x1f7   :  { %173 = vrot.lane.b32.xlu1 %v3236_v40, %s3386_s26 }
 0x1fb   :  { %357 = vperm.xlu1 %3215, %v2552_v42  }
 0x269   :  { %v174_v43 = vpop.permute.xlu1 %173 }
 0x26a   :  { %v176_v44 = vmul.f32 %v3234_v21, %v174_v43 }
 0x26c   :  { %248 = vrot.lane.b32.xlu0 %v176_v44, %s3387_s2 }
 0x27a   :  { %v358_v52 = vpop.permute.xlu1 %357 }
 0x27b   :  { %v360_v55 = vmul.f32 %v3482_v11, %v358_v52 }
 0x2de   :  { %v249_v47 = vpop.permute.xlu0 %248 }
 0x2df   :  { %2795 = vmatmul.mubr.msk.f32.vlgmr.msra.gmra.mrb[4].mxu1 %vm76_vm1, %v249_v47 }
 0x2e0   :  { %3048 = vmatpush3.bf16.msra.mxu1 %v3457_v4  ;;  %2805 = vmatprep.mubr.msk.f32.mxu1 %vm3383_vm0, %v3384_v6 }
 0x2e1   :  { %3049 = vmatprep.subr.bf16.mxu1 %v3382_v3 }
 0x2e4   :  { %3051 = vmatpush3.bf16.msra.mxu1 %v3468_v9 }
 0x2e5   :  { %3058 = vmatprep.subr.bf16.mxu1 %v3382_v3 }
 0x2e7   :  { %2806 = vmatmul.mubr.msk.f32.vlgmr.msra.gmra.mrb[6].mxu1 %vm76_vm1, %v249_v47 }
 0x2e8   :  { %3060 = vmatpush3.bf16.msra.mxu1 %v3523_v37  ;;  %2827 = vmatprep.mubr.msk.f32.mxu1 %vm3383_vm0, %v3384_v6 }
 0x2e9   :  { %3061 = vmatprep.subr.bf16.mxu1 %v3382_v3 }
 0x2ec   :  { %3063 = vmatpush3.bf16.msra.mxu1 %v3537_v41 }
 0x2ed   :  { %3070 = vmatprep.subr.bf16.mxu1 %v3382_v3 }
 0x3b2   :  { %v318_v49 = vpop.f32.mrb[4].mxu1 }
 0x3b3   :  { %v319_v50 = vadd.f32 %v318_v49, %v243_v45  ;;  %v2796_v51 = vpop.f32.mrb[5].mxu1 }
 0x3b5   :  { %v322_v53 = vadd.f32 %v3565_v48, %v319_v50 }
 0x3b7   :  { %v2550_v54 = vmul.f32 -1.442695, %v322_v53 }
 0x3b9   :  { %3237 = vpow2.f32 %v2550_v54 }
 0x3ba   :  { %v427_v56 = vpop.f32.mrb[6].mxu1 }
 0x3bb   :  { %v431_v57 = vadd.f32 %v427_v56, %v360_v55  ;;  %v2807_v58 = vpop.f32.mrb[7].mxu1 }
 0x3bd   :  { %v432_v59 = vadd.f32 %v3488_v13, %v431_v57 }
 0x3bf   :  { %v2554_v60 = vmul.f32 -1.442695, %v432_v59 }
 0x3c1   :  { %3239 = vpow2.f32 %v2554_v60 }
 0x3c3   :  { %v3238_v61 = vpop.eup %3237 }
 0x3c4   :  { %v326_v62 = vadd.f32 1.0, %v3238_v61 }
 0x3c6   :  { %3241 = vrcp.f32 %v326_v62 }
 0x3cb   :  { %v3240_v63 = vpop.eup %3239 }
 0x3cc   :  { %v436_v0 = vadd.f32 1.0, %v3240_v63 }
 0x3ce   :  { %3243 = vrcp.f32 %v436_v0 }
 0x3d0   :  { %v3242_v1 = vpop.eup %3241 }
 0x3d1   :  { %v329_v2 = vmul.f32 2.0, %v3242_v1  ;;  %v331_v17 = vmul.f32 0.0, %v3242_v1 }
 0x3d3   :  { %v2551_v5 = vadd.f32 -1.0, %v329_v2 }
 0x3d5   :  { %333 = vrot.lane.b32.xlu0 %v2551_v5, %s3386_s26 }
 0x3d8   :  { %v3244_v7 = vpop.eup %3243 }
 0x3d9   :  { %v439_v8 = vmul.f32 2.0, %v3244_v7  ;;  %v441_v20 = vmul.f32 %v3244_v7, %v3493_v28 }
 0x3db   :  { %v2555_v10 = vadd.f32 -1.0, %v439_v8 }
 0x3dd   :  { %443 = vrot.lane.b32.xlu1 %v2555_v10, %s3386_s26 }
 0x447   :  { %v334_v12 = vpop.permute.xlu0 %333 }
 0x448   :  { %v336_v14 = vmul.f32 %v3242_v1, %v334_v12 }
 0x44a   :  { %338 = vrot.lane.b32.xlu0 %v336_v14, %s3386_s26 }
 0x44f   :  { %v444_v15 = vpop.permute.xlu1 %443 }
 0x450   :  { %v446_v16 = vmul.f32 %v3244_v7, %v444_v15 }
 0x452   :  { %448 = vrot.lane.b32.xlu1 %v446_v16, %s3386_s26 }
 0x4bc   :  { %v339_v18 = vpop.permute.xlu0 %338 }
 0x4bd   :  { %v3574_v19 = vadd.f32 %v339_v18, %v331_v17 }
 0x4bf   :  { %3245 = vtanh.f32 %v3574_v19 }
 0x4c4   :  { %v449_v21 = vpop.permute.xlu1 %448 }
 0x4c5   :  { %v3578_v22 = vadd.f32 %v449_v21, %v441_v20 }
 0x4c7   :  { %3247 = vtanh.f32 %v3578_v22 }
 0x4c9   :  { %v3246_v23 = vpop.eup %3245 }
 0x4ca   :  { %344 = vrot.lane.b32.xlu0 %v3246_v23, %s3386_s26 }
 0x4d1   :  { %v3248_v24 = vpop.eup %3247 }
 0x4d2   :  { %454 = vrot.lane.b32.xlu1 %v3248_v24, %s3386_s26 }
 0x53c   :  { %v345_v25 = vpop.permute.xlu0 %344 }
 0x53d   :  { %v347_v26 = vmul.f32 %v3242_v1, %v345_v25 }
 0x53f   :  { %349 = vrot.lane.b32.xlu0 %v347_v26, %s3387_s2 }
 0x543   :  { %641 = vperm.xlu0 %3214, %v2560_v27  }
 0x544   :  { %v455_v28 = vpop.permute.xlu1 %454 }
 0x545   :  { %v457_v29 = vmul.f32 %v3244_v7, %v455_v28 }
 0x547   :  { %531 = vrot.lane.b32.xlu1 %v457_v29, %s3387_s2 }
 0x5b1   :  { %v350_v30 = vpop.permute.xlu0 %349 }
 0x5b2   :  { %352 = vst.msk [vmem:[#allocation2] sm:$0xff] %vm76_vm1, %v350_v30  ;;  %2817 = vmatmul.mubr.msk.f32.vlgmr.msra.gmra.mrb[0].mxu0 %vm76_vm1, %v350_v30 }
 0x5b3   :  { %3066 = vmatpush3.bf16.msra.mxu0 %v3457_v4  ;;  %2838 = vmatprep.mubr.msk.f32.mxu0 %vm3383_vm0, %v3384_v6 }
 0x5b4   :  { %3067 = vmatprep.subr.bf16.mxu0 %v3382_v3 }
 0x5b7   :  { %3069 = vmatpush3.bf16.msra.mxu0 %v3468_v9 }
 0x5b8   :  { %3076 = vmatprep.subr.bf16.mxu0 %v3382_v3 }
 0x5b9   :  { %v532_v31 = vpop.permute.xlu1 %531 }
 0x5ba   :  { %2828 = vmatmul.mubr.msk.f32.vlgmr.msra.gmra.mrb[8].mxu1 %vm76_vm1, %v532_v31  ;;  %2839 = vmatmul.mubr.msk.f32.vlgmr.msra.gmra.mrb[2].mxu0 %vm76_vm1, %v532_v31 }
 0x5bb   :  { %3072 = vmatpush3.bf16.msra.mxu1 %v3505_v32  ;;  %3078 = vmatpush3.bf16.msra.mxu0 %v3523_v37 }
 0x5bc   :  { %3073 = vmatprep.subr.bf16.mxu1 %v3382_v3  ;;  %3079 = vmatprep.subr.bf16.mxu0 %v3382_v3 }
 0x5bd   :  { %2860 = vmatprep.mubr.msk.f32.mxu0 %vm3383_vm0, %v3384_v6  ;;  %2849 = vmatprep.mubr.msk.f32.mxu1 %vm3383_vm0, %v3384_v6 }
 0x5bf   :  { %3075 = vmatpush3.bf16.msra.mxu1 %v3511_v34  ;;  %3081 = vmatpush3.bf16.msra.mxu0 %v3537_v41 }
 0x5c0   :  { %3082 = vmatprep.subr.bf16.mxu1 %v3382_v3  ;;  %3088 = vmatprep.subr.bf16.mxu0 %v3382_v3 }
 0x5c2   :  { %v642_v36 = vpop.permute.xlu0 %641 }
 0x5c3   :  { %v644_v38 = vmul.f32 %v3482_v11, %v642_v36 }
 0x685   :  { %v526_v33 = vpop.f32.mrb[0].mxu0 }
 0x686   :  { %v2818_v35 = vpop.f32.mrb[1].mxu0 }
 0x68d   :  { %v601_v39 = vpop.f32.mrb[8].mxu1  ;;  %v711_v40 = vpop.f32.mrb[2].mxu0 }
 0x68e   :  { %v602_v42 = vadd.f32 %v601_v39, %v526_v33  ;;  %v715_v43 = vadd.f32 %v711_v40, %v644_v38  ;;  %v2829_v44 = vpop.f32.mrb[9].mxu1  ;;  %v2840_v45 = vpop.f32.mrb[3].mxu0 }
 0x690   :  { %v605_v46 = vadd.f32 %v3565_v48, %v602_v42  ;;  %v716_v47 = vadd.f32 %v3488_v13, %v715_v43 }
 0x692   :  { %v2558_v49 = vmul.f32 -1.442695, %v605_v46  ;;  %v2562_v50 = vmul.f32 -1.442695, %v716_v47 }
 0x694   :  { %3249 = vpow2.f32 %v2558_v49 }
 0x695   :  { %3251 = vpow2.f32 %v2562_v50 }
 0x69e   :  { %v3250_v51 = vpop.eup %3249 }
 0x69f   :  { %v3252_v52 = vpop.eup %3251  ;;  %v609_v53 = vadd.f32 1.0, %v3250_v51 }
 0x6a0   :  { %v720_v54 = vadd.f32 1.0, %v3252_v52 }
 0x6a1   :  { %3253 = vrcp.f32 %v609_v53 }
 0x6a2   :  { %3255 = vrcp.f32 %v720_v54 }
 0x6ab   :  { %v3254_v55 = vpop.eup %3253 }
 0x6ac   :  { %v3256_v56 = vpop.eup %3255  ;;  %v612_v57 = vmul.f32 2.0, %v3254_v55  ;;  %v614_v1 = vmul.f32 %v3254_v55, %v3574_v19  ;;  %v2568_v19 = vld [vmem:[%s3985_s0 + $0x18] sm:$0xff] }
 0x6ad   :  { %v723_v58 = vmul.f32 2.0, %v3256_v56  ;;  %v725_v2 = vmul.f32 %v3256_v56, %v3578_v22 }
 0x6ae   :  { %v2559_v59 = vadd.f32 -1.0, %v612_v57 }
 0x6af   :  { %v2563_v60 = vadd.f32 -1.0, %v723_v58 }
 0x6b0   :  { %616 = vrot.lane.b32.xlu1 %v2559_v59, %s3386_s26 }
 0x6b1   :  { %727 = vrot.lane.b32.xlu0 %v2563_v60, %s3386_s26 }
 0x722   :  { %v617_v61 = vpop.permute.xlu1 %616 }
 0x723   :  { %v728_v62 = vpop.permute.xlu0 %727  ;;  %v619_v63 = vmul.f32 %v3254_v55, %v617_v61 }
 0x724   :  { %v730_v0 = vmul.f32 %v3256_v56, %v728_v62 }
 0x725   :  { %621 = vrot.lane.b32.xlu1 %v619_v63, %s3386_s26 }
 0x726   :  { %732 = vrot.lane.b32.xlu0 %v730_v0, %s3386_s26 }
 0x797   :  { %v622_v5 = vpop.permute.xlu1 %621 }
 0x798   :  { %v733_v7 = vpop.permute.xlu0 %732  ;;  %v3619_v8 = vadd.f32 %v622_v5, %v614_v1  ;;  %v2576_v1 = vld [vmem:[%s3985_s0 + $0x20] sm:$0xff] }
 0x799   :  { %v3621_v10 = vadd.f32 %v733_v7, %v725_v2 }
 0x79a   :  { %3257 = vtanh.f32 %v3619_v8 }
 0x79b   :  { %3259 = vtanh.f32 %v3621_v10 }
 0x7a4   :  { %v3258_v12 = vpop.eup %3257 }
 0x7a5   :  { %v3260_v14 = vpop.eup %3259  ;;  %627 = vrot.lane.b32.xlu1 %v3258_v12, %s3386_s26 }
 0x7a6   :  { %738 = vrot.lane.b32.xlu0 %v3260_v14, %s3386_s26 }
 0x817   :  { %v628_v15 = vpop.permute.xlu1 %627 }
 0x818   :  { %v739_v16 = vpop.permute.xlu0 %738  ;;  %v630_v17 = vmul.f32 %v3254_v55, %v628_v15 }
 0x819   :  { %v741_v18 = vmul.f32 %v3256_v56, %v739_v16 }
 0x81a   :  { %632 = vrot.lane.b32.xlu1 %v630_v17, %s3387_s2 }
 0x81b   :  { %815 = vrot.lane.b32.xlu0 %v741_v18, %s3387_s2 }
 0x81e   :  { %925 = vperm.xlu1 %3215, %v2568_v19  }
 0x88c   :  { %v633_v20 = vpop.permute.xlu1 %632 }
 0x88d   :  { %v816_v21 = vpop.permute.xlu0 %815  ;;  %636 = vst.msk [vmem:[#allocation2 + $0x8] sm:$0xff] %vm76_vm1, %v633_v20  ;;  %2850 = vmatmul.mubr.msk.f32.vlgmr.msra.gmra.mrb[10].mxu1 %vm76_vm1, %v633_v20 }
 0x88e   :  { %2861 = vmatmul.mubr.msk.f32.vlgmr.msra.gmra.mrb[4].mxu0 %vm76_vm1, %v816_v21  ;;  %3084 = vmatpush3.bf16.msra.mxu1 %v3457_v4 }
 0x88f   :  { %3085 = vmatprep.subr.bf16.mxu1 %v3382_v3  ;;  %2871 = vmatprep.mubr.msk.f32.mxu1 %vm3383_vm0, %v3384_v6 }
 0x890   :  { %3090 = vmatpush3.bf16.msra.mxu0 %v3505_v32  ;;  %2882 = vmatprep.mubr.msk.f32.mxu0 %vm3383_vm0, %v3384_v6 }
 0x891   :  { %3091 = vmatprep.subr.bf16.mxu0 %v3382_v3 }
 0x892   :  { %3087 = vmatpush3.bf16.msra.mxu1 %v3468_v9 }
 0x893   :  { %3094 = vmatprep.subr.bf16.mxu1 %v3382_v3 }
 0x894   :  { %3093 = vmatpush3.bf16.msra.mxu0 %v3511_v34 }
 0x895   :  { %2872 = vmatmul.mubr.msk.f32.vlgmr.msra.gmra.mrb[12].mxu1 %vm76_vm1, %v816_v21  ;;  %3100 = vmatprep.subr.bf16.mxu0 %v3382_v3 }
 0x896   :  { %3096 = vmatpush3.bf16.msra.mxu1 %v3523_v37  ;;  %2893 = vmatprep.mubr.msk.f32.mxu1 %vm3383_vm0, %v3384_v6 }
 0x897   :  { %3097 = vmatprep.subr.bf16.mxu1 %v3382_v3 }
 0x89a   :  { %3099 = vmatpush3.bf16.msra.mxu1 %v3537_v41 }
 0x89b   :  { %3106 = vmatprep.subr.bf16.mxu1 %v3382_v3 }
 0x89d   :  { %v926_v27 = vpop.permute.xlu1 %925 }
 0x89e   :  { %v928_v30 = vmul.f32 %v3482_v11, %v926_v27 }
 0x960   :  { %v810_v22 = vpop.f32.mrb[10].mxu1 }
 0x961   :  { %v885_v23 = vpop.f32.mrb[4].mxu0  ;;  %v2851_v24 = vpop.f32.mrb[11].mxu1 }
 0x962   :  { %v886_v25 = vadd.f32 %v885_v23, %v810_v22  ;;  %v2862_v26 = vpop.f32.mrb[5].mxu0 }
 0x964   :  { %v889_v28 = vadd.f32 %v3565_v48, %v886_v25 }
 0x966   :  { %v2566_v29 = vmul.f32 -1.442695, %v889_v28 }
 0x968   :  { %3261 = vpow2.f32 %v2566_v29  ;;  %v995_v31 = vpop.f32.mrb[12].mxu1 }
 0x969   :  { %v999_v33 = vadd.f32 %v995_v31, %v928_v30  ;;  %v2873_v35 = vpop.f32.mrb[13].mxu1 }
 0x96b   :  { %v1000_v36 = vadd.f32 %v3488_v13, %v999_v33 }
 0x96d   :  { %v2570_v38 = vmul.f32 -1.442695, %v1000_v36 }
 0x96f   :  { %3263 = vpow2.f32 %v2570_v38 }
 0x972   :  { %v3262_v39 = vpop.eup %3261 }
 0x973   :  { %v893_v40 = vadd.f32 1.0, %v3262_v39 }
 0x975   :  { %3265 = vrcp.f32 %v893_v40 }
 0x979   :  { %v3264_v42 = vpop.eup %3263 }
 0x97a   :  { %v1004_v43 = vadd.f32 1.0, %v3264_v42 }
 0x97c   :  { %3267 = vrcp.f32 %v1004_v43 }
 0x97f   :  { %v3266_v44 = vpop.eup %3265 }
 0x980   :  { %v896_v45 = vmul.f32 2.0, %v3266_v44  ;;  %v898_v55 = vmul.f32 %v3266_v44, %v3619_v8 }
 0x982   :  { %v2567_v46 = vadd.f32 -1.0, %v896_v45 }
 0x984   :  { %900 = vrot.lane.b32.xlu0 %v2567_v46, %s3386_s26 }
 0x986   :  { %v3268_v47 = vpop.eup %3267 }
 0x987   :  { %v1007_v49 = vmul.f32 2.0, %v3268_v47  ;;  %v1009_v58 = vmul.f32 %v3268_v47, %v3621_v10 }
 0x989   :  { %v2571_v50 = vadd.f32 -1.0, %v1007_v49 }
 0x98b   :  { %1011 = vrot.lane.b32.xlu1 %v2571_v50, %s3386_s26 }
 0x9f6   :  { %v901_v51 = vpop.permute.xlu0 %900 }
 0x9f7   :  { %v903_v52 = vmul.f32 %v3266_v44, %v901_v51 }
 0x9f9   :  { %905 = vrot.lane.b32.xlu0 %v903_v52, %s3386_s26 }
 0x9fd   :  { %v1012_v53 = vpop.permute.xlu1 %1011 }
 0x9fe   :  { %v1014_v54 = vmul.f32 %v3268_v47, %v1012_v53 }
 0xa00   :  { %1016 = vrot.lane.b32.xlu1 %v1014_v54, %s3386_s26 }
 0xa6b   :  { %v906_v56 = vpop.permute.xlu0 %905 }
 0xa6c   :  { %v3662_v57 = vadd.f32 %v906_v56, %v898_v55 }
 0xa6e   :  { %3269 = vtanh.f32 %v3662_v57 }
 0xa72   :  { %v1017_v59 = vpop.permute.xlu1 %1016 }
 0xa73   :  { %v3666_v60 = vadd.f32 %v1017_v59, %v1009_v58 }
 0xa75   :  { %3271 = vtanh.f32 %v3666_v60 }
 0xa78   :  { %v3270_v61 = vpop.eup %3269 }
 0xa79   :  { %911 = vrot.lane.b32.xlu0 %v3270_v61, %s3386_s26 }
 0xa7f   :  { %v3272_v62 = vpop.eup %3271 }
 0xa80   :  { %1022 = vrot.lane.b32.xlu1 %v3272_v62, %s3386_s26 }
 0xaeb   :  { %v912_v63 = vpop.permute.xlu0 %911 }
 0xaec   :  { %v914_v0 = vmul.f32 %v3266_v44, %v912_v63 }
 0xaee   :  { %916 = vrot.lane.b32.xlu0 %v914_v0, %s3387_s2 }
 0xaf2   :  { %1209 = vperm.xlu0 %3214, %v2576_v1   ;;  %v1023_v2 = vpop.permute.xlu1 %1022 }
 0xaf3   :  { %v1025_v5 = vmul.f32 %v3268_v47, %v1023_v2 }
 0xaf5   :  { %1099 = vrot.lane.b32.xlu1 %v1025_v5, %s3387_s2 }
 0xb60   :  { %v917_v7 = vpop.permute.xlu0 %916 }
 0xb61   :  { %920 = vst.msk [vmem:[#allocation2 + $0x10] sm:$0xff] %vm76_vm1, %v917_v7  ;;  %2883 = vmatmul.mubr.msk.f32.vlgmr.msra.gmra.mrb[6].mxu0 %vm76_vm1, %v917_v7 }
 0xb62   :  { %3102 = vmatpush3.bf16.msra.mxu0 %v3457_v4  ;;  %2904 = vmatprep.mubr.msk.f32.mxu0 %vm3383_vm0, %v3384_v6 }
 0xb63   :  { %3103 = vmatprep.subr.bf16.mxu0 %v3382_v3 }
 0xb66   :  { %3105 = vmatpush3.bf16.msra.mxu0 %v3468_v9 }
 0xb67   :  { %v1100_v8 = vpop.permute.xlu1 %1099  ;;  %3112 = vmatprep.subr.bf16.mxu0 %v3382_v3 }
 0xb68   :  { %2894 = vmatmul.mubr.msk.f32.vlgmr.msra.gmra.mrb[14].mxu1 %vm76_vm1, %v1100_v8 }
 0xb69   :  { %2905 = vmatmul.mubr.msk.f32.vlgmr.msra.gmra.mrb[8].mxu0 %vm76_vm1, %v1100_v8  ;;  %3108 = vmatpush3.bf16.msra.mxu1 %v3505_v32 }
 0xb6a   :  { %3114 = vmatpush3.bf16.msra.mxu0 %v3523_v37  ;;  %3109 = vmatprep.subr.bf16.mxu1 %v3382_v3 }
 0xb6b   :  { %3115 = vmatprep.subr.bf16.mxu0 %v3382_v3  ;;  %2926 = vmatprep.mubr.msk.f32.mxu0 %vm3383_vm0, %v3384_v6 }
 0xb6c   :  { %2915 = vmatprep.mubr.msk.f32.mxu1 %vm3383_vm0, %v3384_v6 }
 0xb6d   :  { %3111 = vmatpush3.bf16.msra.mxu1 %v3511_v34 }
 0xb6e   :  { %3117 = vmatpush3.bf16.msra.mxu0 %v3537_v41  ;;  %3118 = vmatprep.subr.bf16.mxu1 %v3382_v3 }
 0xb6f   :  { %3124 = vmatprep.subr.bf16.mxu0 %v3382_v3 }
 0xb71   :  { %v1210_v14 = vpop.permute.xlu0 %1209 }
 0xb72   :  { %v1212_v15 = vmul.f32 %v3482_v11, %v1210_v14 }
 0xc34   :  { %v1094_v10 = vpop.f32.mrb[6].mxu0 }
 0xc35   :  { %v2884_v12 = vpop.f32.mrb[7].mxu0 }
 0xc3b   :  { %v1169_v16 = vpop.f32.mrb[14].mxu1 }
 0xc3c   :  { %v1170_v17 = vadd.f32 %v1169_v16, %v1094_v10  ;;  %v1279_v18 = vpop.f32.mrb[8].mxu0  ;;  %v2895_v19 = vpop.f32.mrb[15].mxu1 }
 0xc3d   :  { %v1283_v20 = vadd.f32 %v1279_v18, %v1212_v15  ;;  %v2906_v21 = vpop.f32.mrb[9].mxu0 }
 0xc3e   :  { %v1173_v22 = vadd.f32 %v3565_v48, %v1170_v17 }
 0xc3f   :  { %v1284_v23 = vadd.f32 %v3488_v13, %v1283_v20 }
 0xc40   :  { %v2574_v24 = vmul.f32 -1.442695, %v1173_v22 }
 0xc41   :  { %v2578_v25 = vmul.f32 -1.442695, %v1284_v23 }
 0xc42   :  { %3273 = vpow2.f32 %v2574_v24 }
 0xc43   :  { %3275 = vpow2.f32 %v2578_v25 }
 0xc4c   :  { %v3274_v26 = vpop.eup %3273 }
 0xc4d   :  { %v3276_v27 = vpop.eup %3275  ;;  %v1177_v28 = vadd.f32 1.0, %v3274_v26 }
 0xc4e   :  { %v1288_v29 = vadd.f32 1.0, %v3276_v27 }
 0xc4f   :  { %3277 = vrcp.f32 %v1177_v28 }
 0xc50   :  { %3279 = vrcp.f32 %v1288_v29 }
 0xc59   :  { %v3278_v30 = vpop.eup %3277 }
 0xc5a   :  { %v3280_v31 = vpop.eup %3279  ;;  %v1180_v33 = vmul.f32 2.0, %v3278_v30  ;;  %v1182_v44 = vmul.f32 %v3278_v30, %v3662_v57  ;;  %v2584_v57 = vld [vmem:[%s3985_s0 + $0x28] sm:$0xff] }
 0xc5b   :  { %v1291_v35 = vmul.f32 2.0, %v3280_v31  ;;  %v1293_v45 = vmul.f32 %v3280_v31, %v3666_v60 }
 0xc5c   :  { %v2575_v36 = vadd.f32 -1.0, %v1180_v33 }
 0xc5d   :  { %v2579_v38 = vadd.f32 -1.0, %v1291_v35 }
 0xc5e   :  { %1184 = vrot.lane.b32.xlu1 %v2575_v36, %s3386_s26 }
 0xc5f   :  { %1295 = vrot.lane.b32.xlu0 %v2579_v38, %s3386_s26 }
 0xcd0   :  { %v1185_v39 = vpop.permute.xlu1 %1184 }
 0xcd1   :  { %v1296_v40 = vpop.permute.xlu0 %1295  ;;  %v1187_v42 = vmul.f32 %v3278_v30, %v1185_v39 }
 0xcd2   :  { %v1298_v43 = vmul.f32 %v3280_v31, %v1296_v40 }
 0xcd3   :  { %1189 = vrot.lane.b32.xlu1 %v1187_v42, %s3386_s26 }
 0xcd4   :  { %1300 = vrot.lane.b32.xlu0 %v1298_v43, %s3386_s26 }
 0xd45   :  { %v1190_v46 = vpop.permute.xlu1 %1189 }
 0xd46   :  { %v1301_v47 = vpop.permute.xlu0 %1300  ;;  %v3707_v49 = vadd.f32 %v1190_v46, %v1182_v44  ;;  %v2592_v44 = vld [vmem:[%s3985_s0 + $0x30] sm:$0xff] }
 0xd47   :  { %v3709_v50 = vadd.f32 %v1301_v47, %v1293_v45 }
 0xd48   :  { %3281 = vtanh.f32 %v3707_v49 }
 0xd49   :  { %3283 = vtanh.f32 %v3709_v50 }
 0xd52   :  { %v3282_v51 = vpop.eup %3281 }
 0xd53   :  { %v3284_v52 = vpop.eup %3283  ;;  %1195 = vrot.lane.b32.xlu1 %v3282_v51, %s3386_s26 }
 0xd54   :  { %1306 = vrot.lane.b32.xlu0 %v3284_v52, %s3386_s26 }
 0xdc5   :  { %v1196_v53 = vpop.permute.xlu1 %1195 }
 0xdc6   :  { %v1307_v54 = vpop.permute.xlu0 %1306  ;;  %v1198_v55 = vmul.f32 %v3278_v30, %v1196_v53 }
 0xdc7   :  { %v1309_v56 = vmul.f32 %v3280_v31, %v1307_v54 }
 0xdc8   :  { %1200 = vrot.lane.b32.xlu1 %v1198_v55, %s3387_s2 }
 0xdc9   :  { %1383 = vrot.lane.b32.xlu0 %v1309_v56, %s3387_s2 }
 0xdcc   :  { %1493 = vperm.xlu1 %3215, %v2584_v57  }
 0xe3a   :  { %v1201_v58 = vpop.permute.xlu1 %1200 }
 0xe3b   :  { %v1384_v59 = vpop.permute.xlu0 %1383  ;;  %1204 = vst.msk [vmem:[#allocation2 + $0x18] sm:$0xff] %vm76_vm1, %v1201_v58  ;;  %2916 = vmatmul.mubr.msk.f32.vlgmr.msra.gmra.mrb[16].mxu1 %vm76_vm1, %v1201_v58 }
 0xe3c   :  { %2927 = vmatmul.mubr.msk.f32.vlgmr.msra.gmra.mrb[10].mxu0 %vm76_vm1, %v1384_v59  ;;  %3120 = vmatpush3.bf16.msra.mxu1 %v3457_v4 }
 0xe3d   :  { %3121 = vmatprep.subr.bf16.mxu1 %v3382_v3  ;;  %2937 = vmatprep.mubr.msk.f32.mxu1 %vm3383_vm0, %v3384_v6 }
 0xe3e   :  { %3126 = vmatpush3.bf16.msra.mxu0 %v3505_v32  ;;  %2948 = vmatprep.mubr.msk.f32.mxu0 %vm3383_vm0, %v3384_v6 }
 0xe3f   :  { %3127 = vmatprep.subr.bf16.mxu0 %v3382_v3 }
 0xe40   :  { %3123 = vmatpush3.bf16.msra.mxu1 %v3468_v9 }
 0xe41   :  { %3130 = vmatprep.subr.bf16.mxu1 %v3382_v3 }
 0xe42   :  { %3129 = vmatpush3.bf16.msra.mxu0 %v3511_v34 }
 0xe43   :  { %2938 = vmatmul.mubr.msk.f32.vlgmr.msra.gmra.mrb[18].mxu1 %vm76_vm1, %v1384_v59  ;;  %3136 = vmatprep.subr.bf16.mxu0 %v3382_v3 }
 0xe44   :  { %3132 = vmatpush3.bf16.msra.mxu1 %v3523_v37  ;;  %2959 = vmatprep.mubr.msk.f32.mxu1 %vm3383_vm0, %v3384_v6 }
 0xe45   :  { %3133 = vmatprep.subr.bf16.mxu1 %v3382_v3 }
 0xe48   :  { %3135 = vmatpush3.bf16.msra.mxu1 %v3537_v41 }
 0xe49   :  { %3142 = vmatprep.subr.bf16.mxu1 %v3382_v3 }
 0xe4b   :  { %v1494_v1 = vpop.permute.xlu1 %1493 }
 0xe4c   :  { %v1496_v7 = vmul.f32 %v3482_v11, %v1494_v1 }
 0xf0e   :  { %v1378_v60 = vpop.f32.mrb[16].mxu1 }
 0xf0f   :  { %v1453_v61 = vpop.f32.mrb[10].mxu0  ;;  %v2917_v62 = vpop.f32.mrb[17].mxu1 }
 0xf10   :  { %v1454_v63 = vadd.f32 %v1453_v61, %v1378_v60  ;;  %v2928_v0 = vpop.f32.mrb[11].mxu0 }
 0xf12   :  { %v1457_v2 = vadd.f32 %v3565_v48, %v1454_v63 }
 0xf14   :  { %v2582_v5 = vmul.f32 -1.442695, %v1457_v2 }
 0xf16   :  { %3285 = vpow2.f32 %v2582_v5  ;;  %v1563_v8 = vpop.f32.mrb[18].mxu1 }
 0xf17   :  { %v1567_v10 = vadd.f32 %v1563_v8, %v1496_v7  ;;  %v2939_v12 = vpop.f32.mrb[19].mxu1 }
 0xf19   :  { %v1568_v14 = vadd.f32 %v3488_v13, %v1567_v10 }
 0xf1b   :  { %v2586_v15 = vmul.f32 -1.442695, %v1568_v14 }
 0xf1d   :  { %3287 = vpow2.f32 %v2586_v15 }
 0xf20   :  { %v3286_v16 = vpop.eup %3285 }
 0xf21   :  { %v1461_v17 = vadd.f32 1.0, %v3286_v16 }
 0xf23   :  { %3289 = vrcp.f32 %v1461_v17 }
 0xf27   :  { %v3288_v18 = vpop.eup %3287 }
 0xf28   :  { %v1572_v19 = vadd.f32 1.0, %v3288_v18 }
 0xf2a   :  { %3291 = vrcp.f32 %v1572_v19 }
 0xf2d   :  { %v3290_v20 = vpop.eup %3289 }
 0xf2e   :  { %v1464_v21 = vmul.f32 2.0, %v3290_v20  ;;  %v1466_v30 = vmul.f32 %v3290_v20, %v3707_v49 }
 0xf30   :  { %v2583_v22 = vadd.f32 -1.0, %v1464_v21 }
 0xf32   :  { %1468 = vrot.lane.b32.xlu0 %v2583_v22, %s3386_s26 }
 0xf34   :  { %v3292_v23 = vpop.eup %3291 }
 0xf35   :  { %v1575_v24 = vmul.f32 2.0, %v3292_v23  ;;  %v1577_v35 = vmul.f32 %v3292_v23, %v3709_v50 }
 0xf37   :  { %v2587_v25 = vadd.f32 -1.0, %v1575_v24 }
 0xf39   :  { %1579 = vrot.lane.b32.xlu1 %v2587_v25, %s3386_s26 }
 0xfa4   :  { %v1469_v26 = vpop.permute.xlu0 %1468 }
 0xfa5   :  { %v1471_v27 = vmul.f32 %v3290_v20, %v1469_v26 }
 0xfa7   :  { %1473 = vrot.lane.b32.xlu0 %v1471_v27, %s3386_s26 }
 0xfab   :  { %v1580_v28 = vpop.permute.xlu1 %1579 }
 0xfac   :  { %v1582_v29 = vmul.f32 %v3292_v23, %v1580_v28 }
 0xfae   :  { %1584 = vrot.lane.b32.xlu1 %v1582_v29, %s3386_s26 }
0x1019   :  { %v1474_v31 = vpop.permute.xlu0 %1473 }
0x101a   :  { %v3750_v33 = vadd.f32 %v1474_v31, %v1466_v30  ;;  %v2600_v30 = vld [vmem:[%s3985_s0 + $0x38] sm:$0xff] }
0x101c   :  { %3293 = vtanh.f32 %v3750_v33 }
0x1020   :  { %v1585_v36 = vpop.permute.xlu1 %1584 }
0x1021   :  { %v3754_v38 = vadd.f32 %v1585_v36, %v1577_v35 }
0x1023   :  { %3295 = vtanh.f32 %v3754_v38 }
0x1026   :  { %v3294_v39 = vpop.eup %3293 }
0x1027   :  { %1479 = vrot.lane.b32.xlu0 %v3294_v39, %s3386_s26 }
0x102d   :  { %v3296_v40 = vpop.eup %3295 }
0x102e   :  { %1590 = vrot.lane.b32.xlu1 %v3296_v40, %s3386_s26 }
0x1099   :  { %v1480_v42 = vpop.permute.xlu0 %1479 }
0x109a   :  { %v1482_v43 = vmul.f32 %v3290_v20, %v1480_v42 }
0x109c   :  { %1484 = vrot.lane.b32.xlu0 %v1482_v43, %s3387_s2 }
0x10a0   :  { %1777 = vperm.xlu0 %3214, %v2592_v44   ;;  %v1591_v45 = vpop.permute.xlu1 %1590 }
0x10a1   :  { %v1593_v46 = vmul.f32 %v3292_v23, %v1591_v45 }
0x10a3   :  { %1667 = vrot.lane.b32.xlu1 %v1593_v46, %s3387_s2 }
0x110e   :  { %v1485_v47 = vpop.permute.xlu0 %1484 }
0x110f   :  { %1488 = vst.msk [vmem:[#allocation2 + $0x20] sm:$0xff] %vm76_vm1, %v1485_v47  ;;  %2949 = vmatmul.mubr.msk.f32.vlgmr.msra.gmra.mrb[12].mxu0 %vm76_vm1, %v1485_v47 }
0x1110   :  { %3138 = vmatpush3.bf16.msra.mxu0 %v3457_v4  ;;  %2970 = vmatprep.mubr.msk.f32.mxu0 %vm3383_vm0, %v3384_v6 }
0x1111   :  { %3139 = vmatprep.subr.bf16.mxu0 %v3382_v3 }
0x1114   :  { %3141 = vmatpush3.bf16.msra.mxu0 %v3468_v9 }
0x1115   :  { %v1668_v49 = vpop.permute.xlu1 %1667  ;;  %3148 = vmatprep.subr.bf16.mxu0 %v3382_v3 }
0x1116   :  { %2960 = vmatmul.mubr.msk.f32.vlgmr.msra.gmra.mrb[20].mxu1 %vm76_vm1, %v1668_v49 }
0x1117   :  { %2971 = vmatmul.mubr.msk.f32.vlgmr.msra.gmra.mrb[14].mxu0 %vm76_vm1, %v1668_v49  ;;  %3144 = vmatpush3.bf16.msra.mxu1 %v3505_v32 }
0x1118   :  { %3150 = vmatpush3.bf16.msra.mxu0 %v3523_v37  ;;  %3145 = vmatprep.subr.bf16.mxu1 %v3382_v3 }
0x1119   :  { %3151 = vmatprep.subr.bf16.mxu0 %v3382_v3  ;;  %2992 = vmatprep.mubr.msk.f32.mxu0 %vm3383_vm0, %v3384_v6 }
0x111a   :  { %2981 = vmatprep.mubr.msk.f32.mxu1 %vm3383_vm0, %v3384_v6 }
0x111b   :  { %3147 = vmatpush3.bf16.msra.mxu1 %v3511_v34 }
0x111c   :  { %3153 = vmatpush3.bf16.msra.mxu0 %v3537_v41  ;;  %3154 = vmatprep.subr.bf16.mxu1 %v3382_v3 }
0x111d   :  { %3160 = vmatprep.subr.bf16.mxu0 %v3382_v3 }
0x111f   :  { %v1778_v52 = vpop.permute.xlu0 %1777 }
0x1120   :  { %v1780_v53 = vmul.f32 %v3482_v11, %v1778_v52 }
0x11e2   :  { %v1662_v50 = vpop.f32.mrb[12].mxu0 }
0x11e3   :  { %v2950_v51 = vpop.f32.mrb[13].mxu0 }
0x11e9   :  { %v1737_v54 = vpop.f32.mrb[20].mxu1 }
0x11ea   :  { %v1738_v55 = vadd.f32 %v1737_v54, %v1662_v50  ;;  %v1847_v56 = vpop.f32.mrb[14].mxu0  ;;  %v2961_v57 = vpop.f32.mrb[21].mxu1 }
0x11eb   :  { %v1851_v58 = vadd.f32 %v1847_v56, %v1780_v53  ;;  %v2972_v59 = vpop.f32.mrb[15].mxu0 }
0x11ec   :  { %v1741_v60 = vadd.f32 %v3565_v48, %v1738_v55 }
0x11ed   :  { %v1852_v61 = vadd.f32 %v3488_v13, %v1851_v58 }
0x11ee   :  { %v2590_v62 = vmul.f32 -1.442695, %v1741_v60 }
0x11ef   :  { %v2594_v63 = vmul.f32 -1.442695, %v1852_v61 }
0x11f0   :  { %3297 = vpow2.f32 %v2590_v62 }
0x11f1   :  { %3299 = vpow2.f32 %v2594_v63 }
0x11fa   :  { %v3298_v0 = vpop.eup %3297 }
0x11fb   :  { %v3300_v1 = vpop.eup %3299  ;;  %v1745_v2 = vadd.f32 1.0, %v3298_v0 }
0x11fc   :  { %v1856_v5 = vadd.f32 1.0, %v3300_v1 }
0x11fd   :  { %3301 = vrcp.f32 %v1745_v2 }
0x11fe   :  { %3303 = vrcp.f32 %v1856_v5 }
0x1207   :  { %v3302_v11 = vpop.eup %3301 }
0x1208   :  { %v3304_v7 = vpop.eup %3303  ;;  %v1748_v8 = vmul.f32 2.0, %v3302_v11  ;;  %v1750_v18 = vmul.f32 %v3302_v11, %v3750_v33 }
0x1209   :  { %v1859_v10 = vmul.f32 2.0, %v3304_v7  ;;  %v1861_v19 = vmul.f32 %v3304_v7, %v3754_v38 }
0x120a   :  { %v2591_v12 = vadd.f32 -1.0, %v1748_v8 }
0x120b   :  { %v2595_v14 = vadd.f32 -1.0, %v1859_v10 }
0x120c   :  { %1752 = vrot.lane.b32.xlu1 %v2591_v12, %s3386_s26 }
0x120d   :  { %1863 = vrot.lane.b32.xlu0 %v2595_v14, %s3386_s26 }
0x127e   :  { %v1753_v13 = vpop.permute.xlu1 %1752 }
0x127f   :  { %v1864_v15 = vpop.permute.xlu0 %1863  ;;  %v1755_v16 = vmul.f32 %v3302_v11, %v1753_v13 }
0x1280   :  { %v1866_v17 = vmul.f32 %v3304_v7, %v1864_v15 }
0x1281   :  { %1757 = vrot.lane.b32.xlu1 %v1755_v16, %s3386_s26 }
0x1282   :  { %1868 = vrot.lane.b32.xlu0 %v1866_v17, %s3386_s26 }
0x12f3   :  { %v1758_v20 = vpop.permute.xlu1 %1757 }
0x12f4   :  { %v1869_v21 = vpop.permute.xlu0 %1868  ;;  %v3795_v22 = vadd.f32 %v1758_v20, %v1750_v18  ;;  %v3333_v18 = vld [vmem:[%s3991_s6] ss:$0 sm:$0xff] }
0x12f5   :  { %v3797_v23 = vadd.f32 %v1869_v21, %v1861_v19 }
0x12f6   :  { %3305 = vtanh.f32 %v3795_v22 }
0x12f7   :  { %3307 = vtanh.f32 %v3797_v23 }
0x1300   :  { %v3306_v24 = vpop.eup %3305 }
0x1301   :  { %v3308_v25 = vpop.eup %3307  ;;  %1763 = vrot.lane.b32.xlu1 %v3306_v24, %s3386_s26 }
0x1302   :  { %1874 = vrot.lane.b32.xlu0 %v3308_v25, %s3386_s26 }
0x1373   :  { %v1764_v26 = vpop.permute.xlu1 %1763 }
0x1374   :  { %v1875_v27 = vpop.permute.xlu0 %1874  ;;  %v1766_v28 = vmul.f32 %v3302_v11, %v1764_v26 }
0x1375   :  { %v1877_v29 = vmul.f32 %v3304_v7, %v1875_v27 }
0x1376   :  { %1768 = vrot.lane.b32.xlu1 %v1766_v28, %s3387_s2 }
0x1377   :  { %1951 = vrot.lane.b32.xlu0 %v1877_v29, %s3387_s2 }
0x137a   :  { %2061 = vperm.xlu1 %3215, %v2600_v30  }
0x13e8   :  { %v1769_v31 = vpop.permute.xlu1 %1768 }
0x13e9   :  { %v1952_v33 = vpop.permute.xlu0 %1951  ;;  %1772 = vst.msk [vmem:[#allocation2 + $0x28] sm:$0xff] %vm76_vm1, %v1769_v31  ;;  %2982 = vmatmul.mubr.msk.f32.vlgmr.msra.gmra.mrb[22].mxu1 %vm76_vm1, %v1769_v31 }
0x13ea   :  { %2993 = vmatmul.mubr.msk.f32.vlgmr.msra.gmra.mrb[16].mxu0 %vm76_vm1, %v1952_v33  ;;  %3156 = vmatpush3.bf16.msra.mxu1 %v3457_v4 }
0x13eb   :  { %3157 = vmatprep.subr.bf16.mxu1 %v3382_v3  ;;  %3003 = vmatprep.mubr.msk.f32.mxu1 %vm3383_vm0, %v3384_v6 }
0x13ec   :  { %3162 = vmatpush3.bf16.msra.mxu0 %v3505_v32  ;;  %3014 = vmatprep.mubr.msk.f32.mxu0 %vm3383_vm0, %v3384_v6 }
0x13ed   :  { %3163 = vmatprep.subr.bf16.mxu0 %v3382_v3 }
0x13ee   :  { %3159 = vmatpush3.bf16.msra.mxu1 %v3468_v9 }
0x13ef   :  { %3166 = vmatprep.subr.bf16.mxu1 %v3382_v3 }
0x13f0   :  { %3165 = vmatpush3.bf16.msra.mxu0 %v3511_v34 }
0x13f1   :  { %3004 = vmatmul.mubr.msk.f32.vlgmr.msra.gmra.mrb[24].mxu1 %vm76_vm1, %v1952_v33  ;;  %v2346_v33 = vld [vmem:[#allocation2 + $0x28] sm:$0xff] }
0x13f2   :  { %3168 = vmatpush3.bf16.msra.mxu1 %v3523_v37  ;;  %3025 = vmatprep.mubr.msk.f32.mxu1 %vm3383_vm0, %v3384_v6  ;;  %v3331_v37 = vld [vmem:[%s3986_s1] ss:$0 sm:$0xff] }
0x13f3   :  { %3169 = vmatprep.subr.bf16.mxu1 %v3382_v3 }
0x13f6   :  { %3171 = vmatpush3.bf16.msra.mxu1 %v3537_v41  ;;  %v3332_v41 = vld [vmem:[%s3988_s3] ss:$0 sm:$0xff] }
0x13f9   :  { %v2062_v38 = vpop.permute.xlu1 %2061 }
0x13fa   :  { %v2064_v40 = vmul.f32 %v3331_v37, %v2062_v38  ;;  %v2398_v38 = vld [vmem:[%s3992_s7 + $0x88] sm:$0xff] }
0x14bc   :  { %v1946_v4 = vpop.f32.mrb[22].mxu1 }
0x14bd   :  { %v2021_v32 = vpop.f32.mrb[16].mxu0  ;;  %v2983_v35 = vpop.f32.mrb[23].mxu1 }
0x14be   :  { %v2022_v36 = vadd.f32 %v2021_v32, %v1946_v4  ;;  %v2994_v9 = vpop.f32.mrb[17].mxu0  ;;  %v2342_v4 = vld [vmem:[#allocation2 + $0x8] sm:$0xff] }
0x14bf   :  { %v3216_v32 = vpack.i.bf16 %v2342_v4, %v2346_v33  ;;  %v2397_v9 = vld [vmem:[%s3992_s7 + $0x80] sm:$0xff] }
0x14c0   :  { %v2025_v39 = vadd.f32 %v3565_v48, %v2022_v36  ;;  %v3172_v37 = vpack.c.bf16 %v2398_v38, %v2397_v9 }
0x14c2   :  { %v2598_v34 = vmul.f32 -1.442695, %v2025_v39  ;;  %v2381_v39 = vld [vmem:[%s3992_s7] sm:$0xff]  ;;  %3173 = vmatprep.subr.bf16.mxu0 %v3172_v37 }
0x14c4   :  { %3309 = vpow2.f32 %v2598_v34  ;;  %v2131_v6 = vpop.f32.mrb[24].mxu1 }
0x14c5   :  { %v2135_v42 = vadd.f32 %v2131_v6, %v2064_v40  ;;  %v3005_v3 = vpop.f32.mrb[25].mxu1  ;;  %v2382_v40 = vld [vmem:[%s3992_s7 + $0x8] sm:$0xff]  ;;  %v2399_v6 = vld [vmem:[%s3992_s7 + $0x90] sm:$0xff] }
0x14c6   :  { %v3174_v3 = vpack.c.bf16 %v2382_v40, %v2381_v39 }
0x14c7   :  { %v2136_v43 = vadd.f32 %v3332_v41, %v2135_v42  ;;  %v2400_v42 = vld [vmem:[%s3992_s7 + $0x98] sm:$0xff] }
0x14c8   :  { %v3176_v41 = vpack.c.bf16 %v2400_v42, %v2399_v6 }
0x14c9   :  { %v2602_v44 = vmul.f32 -1.442695, %v2136_v43  ;;  %v2383_v43 = vld [vmem:[%s3992_s7 + $0x10] sm:$0xff] }
0x14cb   :  { %3311 = vpow2.f32 %v2602_v44  ;;  %v2384_v44 = vld [vmem:[%s3992_s7 + $0x18] sm:$0xff] }
0x14ce   :  { %v3310_v45 = vpop.eup %3309 }
0x14cf   :  { %v2029_v46 = vadd.f32 1.0, %v3310_v45  ;;  %v2401_v45 = vld [vmem:[%s3992_s7 + $0xa0] sm:$0xff] }
0x14d1   :  { %3313 = vrcp.f32 %v2029_v46  ;;  %v2402_v46 = vld [vmem:[%s3992_s7 + $0xa8] sm:$0xff] }
0x14d5   :  { %v3312_v48 = vpop.eup %3311 }
0x14d6   :  { %v2140_v47 = vadd.f32 1.0, %v3312_v48  ;;  %v2343_v48 = vld [vmem:[#allocation2 + $0x10] sm:$0xff] }
0x14d8   :  { %3315 = vrcp.f32 %v2140_v47  ;;  %v3178_v47 = vpack.c.bf16 %v2384_v44, %v2383_v43 }
0x14db   :  { %v3314_v49 = vpop.eup %3313 }
0x14dc   :  { %v2032_v50 = vmul.f32 2.0, %v3314_v49  ;;  %v2034_v59 = vmul.f32 %v3314_v49, %v3795_v22 }
0x14de   :  { %v2599_v51 = vadd.f32 -1.0, %v2032_v50  ;;  %v3180_v50 = vpack.c.bf16 %v2402_v46, %v2401_v45 }
0x14e0   :  { %2036 = vrot.lane.b32.xlu0 %v2599_v51, %s3386_s26  ;;  %v2385_v51 = vld [vmem:[%s3992_s7 + $0x20] sm:$0xff] }
0x14e2   :  { %v3316_v52 = vpop.eup %3315 }
0x14e3   :  { %v2143_v53 = vmul.f32 2.0, %v3316_v52  ;;  %v2145_v62 = vmul.f32 %v3316_v52, %v3797_v23 }
0x14e5   :  { %v2603_v54 = vadd.f32 -1.0, %v2143_v53  ;;  %v2403_v53 = vld [vmem:[%s3992_s7 + $0xb0] sm:$0xff] }
0x14e7   :  { %2147 = vrot.lane.b32.xlu1 %v2603_v54, %s3386_s26  ;;  %v2404_v54 = vld [vmem:[%s3992_s7 + $0xb8] sm:$0xff] }
0x1552   :  { %v2037_v55 = vpop.permute.xlu0 %2036 }
0x1553   :  { %v2039_v56 = vmul.f32 %v3314_v49, %v2037_v55 }
0x1555   :  { %2041 = vrot.lane.b32.xlu0 %v2039_v56, %s3386_s26  ;;  %v3184_v56 = vpack.c.bf16 %v2404_v54, %v2403_v53 }
0x1559   :  { %v2148_v57 = vpop.permute.xlu1 %2147 }
0x155a   :  { %v2150_v58 = vmul.f32 %v3316_v52, %v2148_v57  ;;  %v2387_v57 = vld [vmem:[%s3992_s7 + $0x30] sm:$0xff] }
0x155c   :  { %2152 = vrot.lane.b32.xlu1 %v2150_v58, %s3386_s26  ;;  %v2388_v58 = vld [vmem:[%s3992_s7 + $0x38] sm:$0xff] }
0x15c7   :  { %v2042_v60 = vpop.permute.xlu0 %2041 }
0x15c8   :  { %v2044_v61 = vadd.f32 %v2042_v60, %v2034_v59  ;;  %v2405_v59 = vld [vmem:[%s3992_s7 + $0xc0] sm:$0xff]  ;;  %v2406_v60 = vld [vmem:[%s3992_s7 + $0xc8] sm:$0xff] }
0x15ca   :  { %3317 = vtanh.f32 %v2044_v61 }
0x15ce   :  { %v2153_v63 = vpop.permute.xlu1 %2152 }
0x15cf   :  { %v2155_v0 = vadd.f32 %v2153_v63, %v2145_v62  ;;  %v3188_v62 = vpack.c.bf16 %v2406_v60, %v2405_v59  ;;  %v2389_v63 = vld [vmem:[%s3992_s7 + $0x40] sm:$0xff] }
0x15d1   :  { %3319 = vtanh.f32 %v2155_v0  ;;  %v2390_v0 = vld [vmem:[%s3992_s7 + $0x48] sm:$0xff] }
0x15d4   :  { %v3318_v1 = vpop.eup %3317 }
0x15d5   :  { %2047 = vrot.lane.b32.xlu0 %v3318_v1, %s3386_s26  ;;  %v2407_v1 = vld [vmem:[%s3992_s7 + $0xd0] sm:$0xff] }
0x15db   :  { %v3320_v2 = vpop.eup %3319 }
0x15dc   :  { %2158 = vrot.lane.b32.xlu1 %v3320_v2, %s3386_s26  ;;  %v2408_v2 = vld [vmem:[%s3992_s7 + $0xd8] sm:$0xff] }
0x1647   :  { %v2048_v5 = vpop.permute.xlu0 %2047 }
0x1648   :  { %v2050_v11 = vmul.f32 %v3314_v49, %v2048_v5  ;;  %v3190_v5 = vpack.c.bf16 %v2390_v0, %v2389_v63 }
0x164a   :  { %2052 = vrot.lane.b32.xlu0 %v2050_v11, %s3387_s2  ;;  %v3192_v11 = vpack.c.bf16 %v2408_v2, %v2407_v1 }
0x164e   :  { %v2159_v7 = vpop.permute.xlu1 %2158 }
0x164f   :  { %v2161_v8 = vmul.f32 %v3316_v52, %v2159_v7  ;;  %v2386_v52 = vld [vmem:[%s3992_s7 + $0x28] sm:$0xff]  ;;  %v2391_v7 = vld [vmem:[%s3992_s7 + $0x50] sm:$0xff] }
0x1650   :  { %v3182_v55 = vpack.c.bf16 %v2386_v52, %v2385_v51 }
0x1651   :  { %2235 = vrot.lane.b32.xlu1 %v2161_v8, %s3387_s2  ;;  %v2392_v8 = vld [vmem:[%s3992_s7 + $0x58] sm:$0xff] }
0x16bc   :  { %v2053_v10 = vpop.permute.xlu0 %2052 }
0x16bd   :  { %2056 = vst.msk [vmem:[#allocation2 + $0x30] sm:$0xff] %vm76_vm1, %v2053_v10  ;;  %3015 = vmatmul.mubr.msk.f32.vlgmr.msra.gmra.mrb[18].mxu0 %vm76_vm1, %v2053_v10  ;;  %v2409_v10 = vld [vmem:[%s3992_s7 + $0xe0] sm:$0xff] }
0x16be   :  { %3175 = vmatpush3.bf16.msra.mxu0 %v3174_v3 }
0x16bf   :  { %3177 = vmatprep.subr.bf16.mxu0 %v3176_v41  ;;  %v2608_v41 = vld [vmem:[%s3993_s8] ss:$0 sm:$0xff] }
0x16c2   :  { %3179 = vmatpush3.bf16.msra.mxu0 %v3178_v47 }
0x16c3   :  { %v2236_v12 = vpop.permute.xlu1 %2235  ;;  %3181 = vmatprep.subr.bf16.mxu0 %v3180_v50 }
0x16c4   :  { %3026 = vmatmul.mubr.msk.f32.vlgmr.msra.gmra.mrb[26].mxu1 %vm76_vm1, %v2236_v12  ;;  %v2347_v36 = vld [vmem:[#allocation2 + $0x30] sm:$0xff]  ;;  %v2410_v12 = vld [vmem:[%s3992_s7 + $0xe8] sm:$0xff] }
0x16c5   :  { %v3221_v49 = vpack.i.bf16 %v2343_v48, %v2347_v36  ;;  %v2345_v36 = vld [vmem:[#allocation2 + $0x20] sm:$0xff] }
0x16c6   :  { %3183 = vmatpush3.bf16.msra.mxu0 %v3182_v55 }
0x16c7   :  { %3185 = vmatprep.subr.bf16.mxu0 %v3184_v56 }
0x1790   :  { %v2230_v14 = vpop.f32.mrb[18].mxu0 }
0x1791   :  { %v3016_v13 = vpop.f32.mrb[19].mxu0 }
0x1792   :  { %v3196_v13 = vpack.c.bf16 %v2410_v12, %v2409_v10 }
0x1797   :  { %v2305_v15 = vpop.f32.mrb[26].mxu1 }
0x1798   :  { %v2306_v16 = vadd.f32 %v2305_v15, %v2230_v14  ;;  %v3027_v17 = vpop.f32.mrb[27].mxu1  ;;  %v3194_v14 = vpack.c.bf16 %v2392_v8, %v2391_v7  ;;  %v2393_v15 = vld [vmem:[%s3992_s7 + $0x60] sm:$0xff] }
0x179a   :  { %v2309_v19 = vadd.f32 %v3333_v18, %v2306_v16  ;;  %v2394_v16 = vld [vmem:[%s3992_s7 + $0x68] sm:$0xff]  ;;  %v2411_v18 = vld [vmem:[%s3992_s7 + $0xf0] sm:$0xff] }
0x179b   :  { %v3198_v17 = vpack.c.bf16 %v2394_v16, %v2393_v15 }
0x179c   :  { %v2606_v20 = vmul.f32 -1.442695, %v2309_v19  ;;  %v2412_v19 = vld [vmem:[%s3992_s7 + $0xf8] sm:$0xff] }
0x179e   :  { %3321 = vpow2.f32 %v2606_v20  ;;  %v3200_v20 = vpack.c.bf16 %v2412_v19, %v2411_v18 }
0x17a8   :  { %v3322_v21 = vpop.eup %3321 }
0x17a9   :  { %v2313_v22 = vadd.f32 1.0, %v3322_v21  ;;  %v2395_v21 = vld [vmem:[%s3992_s7 + $0x70] sm:$0xff] }
0x17ab   :  { %3323 = vrcp.f32 %v2313_v22  ;;  %v2396_v22 = vld [vmem:[%s3992_s7 + $0x78] sm:$0xff] }
0x17b5   :  { %v3324_v23 = vpop.eup %3323 }
0x17b6   :  { %v2316_v24 = vmul.f32 2.0, %v3324_v23  ;;  %v2318_v28 = vmul.f32 %v3324_v23, %v2044_v61  ;;  %v3186_v61 = vpack.c.bf16 %v2388_v58, %v2387_v57 }
0x17b8   :  { %v2607_v25 = vadd.f32 -1.0, %v2316_v24  ;;  %3187 = vmatpush3.bf16.msra.mxu0 %v3186_v61 }
0x17b9   :  { %3189 = vmatprep.subr.bf16.mxu0 %v3188_v62 }
0x17ba   :  { %2320 = vrot.lane.b32.xlu0 %v2607_v25, %s3386_s26  ;;  %v2344_v25 = vld [vmem:[#allocation2 + $0x18] sm:$0xff] }
0x17bc   :  { %3191 = vmatpush3.bf16.msra.mxu0 %v3190_v5 }
0x17bd   :  { %3193 = vmatprep.subr.bf16.mxu0 %v3192_v11 }
0x17c0   :  { %3195 = vmatpush3.bf16.msra.mxu0 %v3194_v14 }
0x17c1   :  { %3197 = vmatprep.subr.bf16.mxu0 %v3196_v13 }
0x17c4   :  { %3199 = vmatpush3.bf16.msra.mxu0 %v3198_v17 }
0x17c5   :  { %3201 = vmatprep.subr.bf16.mxu0 %v3200_v20 }
0x182c   :  { %v2321_v26 = vpop.permute.xlu0 %2320 }
0x182d   :  { %v2323_v27 = vmul.f32 %v3324_v23, %v2321_v26 }
0x182f   :  { %2325 = vrot.lane.b32.xlu1 %v2323_v27, %s3386_s26 }
0x18a1   :  { %v2326_v29 = vpop.permute.xlu1 %2325 }
0x18a2   :  { %v2328_v30 = vadd.f32 %v2326_v29, %v2318_v28 }
0x18a4   :  { %3325 = vtanh.f32 %v2328_v30 }
0x18ae   :  { %v3326_v31 = vpop.eup %3325 }
0x18af   :  { %2331 = vrot.lane.b32.xlu0 %v3326_v31, %s3386_s26 }
0x18b3   :  { %3217 = vrot.lane.b32.xlu0 %v3216_v32, %s3386_s26  ;;  %v2341_v32 = vld [vmem:[#allocation2] sm:$0xff] }
0x1921   :  { %v2332_v35 = vpop.permute.xlu0 %2331 }
0x1922   :  { %v2334_v34 = vmul.f32 %v3324_v23, %v2332_v35  ;;  %v3202_v23 = vpack.c.bf16 %v2396_v22, %v2395_v21 }
0x1924   :  { %2336 = vrot.lane.b32.xlu1 %v2334_v34, %s3387_s2  ;;  %3203 = vmatpush3.bf16.msra.mxu0 %v3202_v23 }
0x1925   :  { %v3218_v28 = vpop.permute.xlu0 %3217 }
0x1926   :  { %v3220_v30 = vunpack.i.h.bf16 %v3218_v28  ;;  %v3219_v31 = vunpack.i.l.bf16 %v3218_v28 }
0x1928   :  { %3222 = vrot.lane.b32.xlu1 %v3221_v49, %s3387_s2  ;;  %v2373_v9 = vsel %vm76_vm1, %v2341_v32, %v3220_v30  ;;  %v2378_v34 = vsel %vm76_vm1, %v2345_v36, %v3219_v31 }
0x1996   :  { %v2337_v24 = vpop.permute.xlu1 %2336 }
0x1997   :  { %2340 = vst.msk [vmem:[#allocation2 + $0x38] sm:$0xff] %vm76_vm1, %v2337_v24 }
0x199a   :  { %v3223_v29 = vpop.permute.xlu1 %3222 }
0x199b   :  { %v3225_v33 = vunpack.i.h.bf16 %v3223_v29  ;;  %v3224_v4 = vunpack.i.l.bf16 %v3223_v29 }
0x199d   :  { %v2379_v37 = vsel %vm2374_vm2, %v2378_v34, %v3224_v4  ;;  %v2375_v40 = vsel %vm2374_vm2, %v2373_v9, %v3225_v33 }
0x199e   :  { %v2348_v26 = vld [vmem:[#allocation2 + $0x38] sm:$0xff] }
0x199f   :  { %v3226_v27 = vpack.i.bf16 %v2344_v25, %v2348_v26 }
0x19a1   :  { %3227 = vrot.lane.b32.xlu0 %v3226_v27, %s3388_s28 }
0x1a13   :  { %v3228_v35 = vpop.permute.xlu0 %3227 }
0x1a14   :  { %v3230_v38 = vunpack.i.h.bf16 %v3228_v35  ;;  %v3229_v39 = vunpack.i.l.bf16 %v3228_v35 }
0x1a16   :  { %v2380_v6 = vsel %vm2376_vm3, %v2379_v37, %v3229_v39  ;;  %v2377_v42 = vsel %vm2376_vm3, %v2375_v40, %v3230_v38 }
0x1a17   :  { %2484 = vmatprep.mubr.f32.mxu0 %v2380_v6 }
0x1a18   :  { %2485 = vmatmul.mubr.f32.vlgmr.msra.gmra.mrb[20].mxu0 %v2377_v42 }
0x1aeb   :  { %v2761_v3 = vpop.f32.mrb[20].mxu0 }
0x1aec   :  { %v2762_v43 = vpop.f32.mrb[21].mxu0 }
0x1aed   :  { %v2763_v44 = vadd.f32 %v2762_v43, %v2761_v3 }
0x1aef   :  { %v2487_v45 = vadd.f32 %v2763_v44, %v2608_v41 }
0x1af1   :  { %v2495_v46 = vand.u32 2147483647, %v2487_v45  ;;  %2491 = vst.msk [vmem:[#allocation3] sm:$0xff] %vm2490_vm4, %v2487_v45 }
0x1af3   :  { %v2496_v48 = vsub.f32 0.0, %v2495_v46 }
0x1af5   :  { %v2497_v47 = vmul.f32 1.442695, %v2496_v48 }
0x1af7   :  { %3327 = vpow2.f32 %v2497_v47 }
0x1b01   :  { %v3328_v49 = vpop.eup %3327 }
0x1b02   :  { %v2499_v50 = vadd.f32 1.0, %v3328_v49  ;;  %v2502_v51 = vmul.f32 -0.5, %v3328_v49 }
0x1b04   :  { %3329 = vlog2.f32 %v2499_v50  ;;  %v2503_v52 = vadd.f32 1.0, %v2502_v51 }
0x1b05   :  { %3345 = shalt.err (!%p3342_p4)
}
0x1b06   :  { %s3346_s14 = scalar_lea.hbm %s3994_s9, 128 }
0x1b07   :  { %p3347_p5 = scmp.ne.s32.totalorder %s3994_s9, %s3346_s14  ;;  %p3350_p6 = scmp.lt.u32.totalorder %s3346_s14, %s3994_s9 }
0x1b09   :  { %p3352_p7 = pnand %p3350_p6, %p3347_p5 }
0x1b0b   :  { %3355 = shalt.err (!%p3352_p7)
}
0x1b0c   :  { %2525 = dma.vmem_to_hbm [thread:$0]  %s2523_s11, 128, %s3994_s9, [#allocation4]   ;;  %v2505_v53 = vand.u32 2147483647, %v3328_v49  ;;  %v2504_v56 = vmul.f32 %v3328_v49, %v2503_v52  ;;  %v2492_v57 = vmax.f32 %v2487_v45, 0.0  ;;  %vm2493_vm6 = vcmp.ne.f32.partialorder %v2487_v45, %v2487_v45 }
0x1b0d   :  { %s3390_s19 = smov 120   ;;  %s3391_s1 = smov [#allocation5]  }
0x1b0e   :  { %v3330_v54 = vpop.eup %3329  ;;  %vm2506_vm5 = vcmp.lt.f32.partialorder %v2505_v53, 0.0004427343  ;;  %s2532_s3 = sshll.u32 %s3391_s1, 4  ;;  %s2533_s3 = int_to_ptr.vmem [resolvable:$true] %s2532_s3 }
0x1b0f   :  { %v2501_v55 = vmul.f32 0.6931472, %v3330_v54  ;;  %s3356_s9 = scalar_lea.vmem %s2533_s3, 128  ;;  %p3361_p9 = scmp.lt.s32.totalorder %s2533_s3, %s2533_s3 }
0x1b10   :  { %p3357_p8 = scmp.ne.s32.totalorder %s2533_s3, %s3356_s9  ;;  %p3362_p10 = scmp.lt.s32.totalorder %s3356_s9, %s3356_s9 }
0x1b11   :  { %v2507_v58 = vsel %vm2506_vm5, %v2504_v56, %v2501_v55 }
0x1b12   :  { %v2508_v59 = vadd.f32 %v2507_v58, %v2492_v57  ;;  %p3363_p11 = por %p3362_p10, %p3361_p9 }
0x1b14   :  { %v2509_v60 = vsel %vm2493_vm6, %v2487_v45, %v2508_v59  ;;  %p3364_p12 = pnand %p3363_p11, %p3357_p8 }
0x1b15   :  { %v2510_v61 = vadd.f32 0.001, %v2509_v60 }
0x1b17   :  { %2512 = vrot.lane.b32.xlu1 %v2510_v61, %s3390_s19 }
0x1b89   :  { %v2513_v62 = vpop.permute.xlu1 %2512 }
0x1b8a   :  { %2515 = vst.msk [vmem:[#allocation5] sm:$0xff] %vm2490_vm4, %v2513_v62 }
0x1b8b   :  { %3367 = shalt.err (!%p3364_p12)
}
0x1b8c   :  { %s3368_s21 = scalar_lea.hbm %s3995_s10, 128 }
0x1b8d   :  { %p3369_p13 = scmp.ne.s32.totalorder %s3995_s10, %s3368_s21  ;;  %p3372_p0 = scmp.lt.u32.totalorder %s3368_s21, %s3995_s10 }
0x1b8f   :  { %p3374_p1 = pnand %p3372_p0, %p3369_p13 }
0x1b91   :  { %3377 = shalt.err (!%p3374_p1)
}
0x1b92   :  { %2535 = dma.vmem_to_hbm [thread:$0]  %s2533_s3, 128, %s3995_s10, [#allocation6]  }
0x1b93   :  { %3378 = dma.done.wait [#allocation4], 128  }
0x1b94   :  { %3379 = vsyncadd [#allocation4], 4294967168 }
0x1b95   :  { %3380 = dma.done.wait [#allocation6], 128  }
0x1b96   :  { %3381 = vsyncadd [#allocation6], 4294967168 }
0x1b97   :  { %2542 = vsyncpa [#allocation4], 1 }
0x1b98   :  { %2543 = vsyncpa [#allocation6], 1 }

</bundles_post_ra>
